<compile_context>
chip_gen: v6e
topology: v6e:2x2x1
jax: 0.10.0
libtpu: 0.0.40
codegen_flags: <defaults>
</compile_context>

<pallas_src>
import functools

import jax
import jax.numpy as jnp
from jax.experimental import pallas as pl
from jax.experimental.pallas import tpu as pltpu  # noqa: F401  (TPU backend)


def _round_up(n, m):
    return ((n + m - 1) // m) * m


# ------------------------------ Fused forward kernel ------------------------------
def fused_alvin_lstm_kernel(x_ref, w_ref, out_ref, *, T, B, D, H, L, O):
    G = 4 * H
    Dp = _round_up(D, 8)

    # ---- Hoisted, 8-row-aligned unpacking of the packed weight slab ----
    off = 0
    w_ih0 = w_ref[off:off + D, :]; off += Dp              # (D, 4H)
    w_hh0 = w_ref[off:off + H, :]; off += H               # (H, 4H)
    b0 = w_ref[off:off + 1, :]; off += 8                  # (1, 4H)
    deep = []
    for _ in range(L - 1):
        w_ih = w_ref[off:off + H, :]; off += H            # (H, 4H)
        w_hh = w_ref[off:off + H, :]; off += H            # (H, 4H)
        b = w_ref[off:off + 1, :]; off += 8               # (1, 4H)
        deep.append((w_ih, w_hh, b))
    w_out = w_ref[off:off + H, :]; off += H               # (H, 4H), zero cols beyond O
    b_out = w_ref[off:off + 1, :]                         # (1, 4H), zero cols beyond O

    # Lane mask picking the 'g' quarter — hoisted (JAX does not CSE broadcasted iota).
    lane = jax.lax.broadcasted_iota(jnp.int32, (B, G), 1)
    g_lanes = (lane >= 2 * H) & (lane < 3 * H)

    def cell(gates, c_prev):
        # One sigmoid pass over the whole (B, 4H) slab.  The g columns were pre-scaled
        # by 2 at pack time, so tanh(g) == 2*sigmoid(2g) - 1 is recovered with a cheap
        # VPU select instead of a second EUP pass.
        s = jax.nn.sigmoid(gates)
        act = jnp.where(g_lanes, 2.0 * s - 1.0, s)
        i = act[:, 0 * H:1 * H]
        f = act[:, 1 * H:2 * H]
        g = act[:, 2 * H:3 * H]
        o = act[:, 3 * H:4 * H]
        c_new = f * c_prev + i * g
        h_new = o * jnp.tanh(c_new)
        return h_new, c_new

    zeros = jnp.zeros((B, H), jnp.float32)
    h = [zeros] * L
    c = [zeros] * L

    # Fully unrolled serial time loop (T static & small) — compile-time-constant slices.
    for t in range(T):
        x_t = x_ref[:, t * D:(t + 1) * D]                 # (B, D) lane sub-slice
        # Two accumulated dots (no cross-lane concat); the x_t dot has no recurrent
        # dependency, so only h[0] @ w_hh0 sits on the serial chain.
        gates = (jnp.dot(x_t, w_ih0, preferred_element_type=jnp.float32)
                 + jnp.dot(h[0], w_hh0, preferred_element_type=jnp.float32)
                 + b0)
        h[0], c[0] = cell(gates, c[0])
        for l in range(1, L):
            w_ih, w_hh, b = deep[l - 1]
            # h[l] @ w_hh does not depend on this step's lower-layer output -> off the
            # critical path; no per-step XLU concat.
            gates = (jnp.dot(h[l - 1], w_ih, preferred_element_type=jnp.float32)
                     + jnp.dot(h[l], w_hh, preferred_element_type=jnp.float32)
                     + b)
            h[l], c[l] = cell(gates, c[l])

    # Final Linear on the last timestep's top-layer hidden state.
    res = jnp.dot(h[L - 1], w_out, preferred_element_type=jnp.float32) + b_out  # (B, 4H)
    out_ref[...] = res[:, :O]


# ----------------------------------- Wrapper ---------------------------------------
def make_forward(D, H, L, O):
    G = 4 * H

    @jax.jit
    def forward(x, packed_w):
        """x: (B, T, D) batch-first.  packed_w: pre-packed weight slab.  -> (B, O)."""
        B, T, _ = x.shape
        # Layout-compatible reshape (row-major): a bitcast, no copy / extra launch.
        x2 = x.reshape(B, T * D)

        flops = (2 * T * B * D * G            # layer-0 input projections
                 + 2 * T * B * H * G          # layer-0 recurrence
                 + (L - 1) * 4 * T * B * H * G  # deeper layers (two H-deep dots each)
                 + 2 * B * H * O)             # output Linear
        transcendentals = T * L * B * 5 * H   # one sigmoid slab + tanh(c) per step/layer
        bytes_accessed = 4 * (B * T * D + int(packed_w.size) + B * O)

        kernel = functools.partial(fused_alvin_lstm_kernel,
                                   T=T, B=B, D=D, H=H, L=L, O=O)
        return pl.pallas_call(
            kernel,
            out_shape=jax.ShapeDtypeStruct((B, O), jnp.float32),
            cost_estimate=pl.CostEstimate(flops=flops,
                                          transcendentals=transcendentals,
                                          bytes_accessed=bytes_accessed),
        )(x2, packed_w)

    return forward


# ------------------------------ Param init / packing --------------------------------
def init_raw_params(key, input_dim, hidden_dim, layer_dim, output_dim):
    """PyTorch-style uniform(-1/sqrt(H), 1/sqrt(H)) init, raw (untransposed) shapes."""
    bound = 1.0 / float(hidden_dim) ** 0.5
    lstm_raw = []
    in_d = input_dim
    for _ in range(layer_dim):
        key, k1, k2, k3, k4 = jax.random.split(key, 5)
        w_ih = jax.random.uniform(k1, (4 * hidden_dim, in_d), jnp.float32, -bound, bound)
        w_hh = jax.random.uniform(k2, (4 * hidden_dim, hidden_dim), jnp.float32, -bound, bound)
        b_ih = jax.random.uniform(k3, (4 * hidden_dim,), jnp.float32, -bound, bound)
        b_hh = jax.random.uniform(k4, (4 * hidden_dim,), jnp.float32, -bound, bound)
        lstm_raw.append((w_ih, w_hh, b_ih, b_hh))
        in_d = hidden_dim
    key, k5, k6 = jax.random.split(key, 3)
    out_w = jax.random.uniform(k5, (output_dim, hidden_dim), jnp.float32, -bound, bound)
    out_b = jax.random.uniform(k6, (output_dim,), jnp.float32, -bound, bound)
    return lstm_raw, out_w, out_b


def pack_kernel_params(lstm_raw, out_w, out_b, hidden_dim):
    """Pack all weights/biases into one (rows, 4H) f32 slab (run ONCE, outside jit).

    - Weights stored pre-transposed (K, 4H); b_ih + b_hh pre-combined.
    - 'g' (cell-candidate) columns of every LSTM weight/bias pre-scaled by exactly 2
      so the kernel needs a single sigmoid pass per step/layer.
    - Every section starts at an 8-row-aligned offset; the output Linear is
      zero-padded to 4H columns.
    """
    H = hidden_dim
    G = 4 * H
    assert out_w.shape[0] <= G, "output_dim must be <= 4*hidden_dim for column packing"

    def scale_g(a):  # a: (K, 4H)
        return a.at[:, 2 * H:3 * H].multiply(2.0)

    blocks = []

    def add(a, rows_pad=None):
        a = jnp.asarray(a, jnp.float32)
        r, cols = a.shape
        if cols < G:
            a = jnp.pad(a, ((0, 0), (0, G - cols)))
        rp = _round_up(r, 8) if rows_pad is None else rows_pad
        if rp > r:
            a = jnp.pad(a, ((0, rp - r), (0, 0)))
        blocks.append(a)

    for (w_ih, w_hh, b_ih, b_hh) in lstm_raw:
        add(scale_g(jnp.asarray(w_ih, jnp.float32).T))                       # (in, 4H)
        add(scale_g(jnp.asarray(w_hh, jnp.float32).T))                       # (H, 4H)
        add(scale_g((jnp.asarray(b_ih, jnp.float32)
                     + jnp.asarray(b_hh, jnp.float32))[None, :]), rows_pad=8)
    add(jnp.asarray(out_w, jnp.float32).T)                                   # (H, O)
    add(jnp.asarray(out_b, jnp.float32)[None, :], rows_pad=8)                # (1, O)
    return jnp.concatenate(blocks, axis=0)


# -------------------------------- Pure-JAX reference --------------------------------
def reference_forward(x, lstm_raw, out_w, out_b):
    """Standard LSTM + Linear, matching PyTorch semantics (zero initial state)."""
    B = x.shape[0]
    seq = jnp.transpose(x, (1, 0, 2)).astype(jnp.float32)   # (T, B, D)
    for (w_ih, w_hh, b_ih, b_hh) in lstm_raw:
        H = w_hh.shape[1]
        h = jnp.zeros((B, H), jnp.float32)
        c = jnp.zeros((B, H), jnp.float32)
        outs = []
        for t in range(seq.shape[0]):
            gates = seq[t] @ w_ih.T + h @ w_hh.T + b_ih + b_hh
            i = jax.nn.sigmoid(gates[:, 0 * H:1 * H])
            f = jax.nn.sigmoid(gates[:, 1 * H:2 * H])
            g = jnp.tanh(gates[:, 2 * H:3 * H])
            o = jax.nn.sigmoid(gates[:, 3 * H:4 * H])
            c = f * c + i * g
            h = o * jnp.tanh(c)
            outs.append(h)
        seq = jnp.stack(outs, axis=0)
    return seq[-1] @ out_w.T + out_b


if __name__ == "__main__":
    # Small shapes consistent with the module: batch=2, seq=8, input_dim=16,
    # hidden_dim=32, layer_dim=2, output_dim=8.
    B, T, D_IN, HID, LAYERS, D_OUT = 2, 8, 16, 32, 2, 8

    key = jax.random.PRNGKey(0)
    key, kx = jax.random.split(key)
    x = jax.random.normal(kx, (B, T, D_IN), jnp.float32)

    lstm_raw, out_w, out_b = init_raw_params(key, D_IN, HID, LAYERS, D_OUT)
    packed_w = pack_kernel_params(lstm_raw, out_w, out_b, HID)   # once, outside jit

    forward = make_forward(D_IN, HID, LAYERS, D_OUT)
    out = jax.block_until_ready(forward(x, packed_w))

    ref = reference_forward(x, lstm_raw, out_w, out_b)
    assert out.shape == (B, D_OUT)
    assert jnp.allclose(out, ref, atol=2e-5, rtol=2e-5)

    print("KERNEL_OK")
</pallas_src>

<mosaic_0001>
module attributes {stable_mosaic.version = 11 : i64} {
  func.func @fused_alvin_lstm_kernel(%arg0: memref<2x128xf32, #tpu.memory_space<vmem>>, %arg1: memref<168x128xf32, #tpu.memory_space<vmem>>, %arg2: memref<2x8xf32, #tpu.memory_space<vmem>>) attributes {dimension_semantics = [], scalar_prefetch = 0 : i64, scratch_operands = 0 : i64, tpu.core_type = #tpu.core_type<tc>} {
    %c0 = arith.constant 0 : index
    %c0_0 = arith.constant 0 : index
    %0 = vector.load %arg1[%c0, %c0_0] : memref<168x128xf32, #tpu.memory_space<vmem>>, vector<16x128xf32>
    %c16 = arith.constant 16 : index
    %c0_1 = arith.constant 0 : index
    %1 = vector.load %arg1[%c16, %c0_1] : memref<168x128xf32, #tpu.memory_space<vmem>>, vector<32x128xf32>
    %c48 = arith.constant 48 : index
    %c0_2 = arith.constant 0 : index
    %2 = vector.load %arg1[%c48, %c0_2] : memref<168x128xf32, #tpu.memory_space<vmem>>, vector<1x128xf32>
    %c56 = arith.constant 56 : index
    %c0_3 = arith.constant 0 : index
    %3 = vector.load %arg1[%c56, %c0_3] : memref<168x128xf32, #tpu.memory_space<vmem>>, vector<32x128xf32>
    %c88 = arith.constant 88 : index
    %c0_4 = arith.constant 0 : index
    %4 = vector.load %arg1[%c88, %c0_4] : memref<168x128xf32, #tpu.memory_space<vmem>>, vector<32x128xf32>
    %c120 = arith.constant 120 : index
    %c0_5 = arith.constant 0 : index
    %5 = vector.load %arg1[%c120, %c0_5] : memref<168x128xf32, #tpu.memory_space<vmem>>, vector<1x128xf32>
    %c128 = arith.constant 128 : index
    %c0_6 = arith.constant 0 : index
    %6 = vector.load %arg1[%c128, %c0_6] : memref<168x128xf32, #tpu.memory_space<vmem>>, vector<32x128xf32>
    %c160 = arith.constant 160 : index
    %c0_7 = arith.constant 0 : index
    %7 = vector.load %arg1[%c160, %c0_7] : memref<168x128xf32, #tpu.memory_space<vmem>>, vector<1x128xf32>
    %8 = tpu.iota {dimensions = array<i32: 1>} : vector<2x128xi32>
    %c64_i32 = arith.constant 64 : i32
    %9 = vector.broadcast %c64_i32 : i32 to vector<2x128xi32>
    %10 = arith.cmpi sge, %8, %9 : vector<2x128xi32>
    %c96_i32 = arith.constant 96 : i32
    %11 = vector.broadcast %c96_i32 : i32 to vector<2x128xi32>
    %12 = arith.cmpi slt, %8, %11 : vector<2x128xi32>
    %13 = arith.andi %10, %12 : vector<2x128xi1>
    %cst = arith.constant 0.000000e+00 : f32
    %14 = vector.broadcast %cst : f32 to vector<2x32xf32>
    %c0_8 = arith.constant 0 : index
    %c0_9 = arith.constant 0 : index
    %15 = vector.load %arg0[%c0_8, %c0_9] : memref<2x128xf32, #tpu.memory_space<vmem>>, vector<2x16xf32>
    %cst_10 = arith.constant dense<0.000000e+00> : vector<2x128xf32>
    %16 = tpu.matmul %15, %0, %cst_10 {dimension_numbers = #tpu.dot_dimension_numbers<[1], [0], [0], [1], [0, 0, 1, 1], [], []>} : vector<2x16xf32>, vector<16x128xf32>, vector<2x128xf32> -> vector<2x128xf32>
    %cst_11 = arith.constant dense<0.000000e+00> : vector<2x128xf32>
    %17 = tpu.matmul %14, %1, %cst_11 {dimension_numbers = #tpu.dot_dimension_numbers<[1], [0], [0], [1], [0, 0, 1, 1], [], []>} : vector<2x32xf32>, vector<32x128xf32>, vector<2x128xf32> -> vector<2x128xf32>
    %18 = arith.addf %16, %17 : vector<2x128xf32>
    %19 = vector.broadcast %2 : vector<1x128xf32> to vector<2x128xf32>
    %20 = arith.addf %18, %19 : vector<2x128xf32>
    %21 = arith.negf %20 : vector<2x128xf32>
    %22 = math.exp %21 : vector<2x128xf32>
    %cst_12 = arith.constant 1.000000e+00 : f32
    %23 = vector.broadcast %cst_12 : f32 to vector<2x128xf32>
    %24 = arith.addf %23, %22 : vector<2x128xf32>
    %25 = arith.divf %23, %24 : vector<2x128xf32>
    %cst_13 = arith.constant 2.000000e+00 : f32
    %26 = vector.broadcast %cst_13 : f32 to vector<2x128xf32>
    %27 = arith.mulf %26, %25 : vector<2x128xf32>
    %cst_14 = arith.constant 1.000000e+00 : f32
    %28 = vector.broadcast %cst_14 : f32 to vector<2x128xf32>
    %29 = arith.subf %27, %28 : vector<2x128xf32>
    %30 = arith.select %13, %29, %25 : vector<2x128xi1>, vector<2x128xf32>
    %31 = vector.extract_strided_slice %30 {offsets = [0, 0], sizes = [2, 32], strides = [1, 1]} : vector<2x128xf32> to vector<2x32xf32>
    %32 = vector.extract_strided_slice %30 {offsets = [0, 32], sizes = [2, 32], strides = [1, 1]} : vector<2x128xf32> to vector<2x32xf32>
    %33 = vector.extract_strided_slice %30 {offsets = [0, 64], sizes = [2, 32], strides = [1, 1]} : vector<2x128xf32> to vector<2x32xf32>
    %34 = vector.extract_strided_slice %30 {offsets = [0, 96], sizes = [2, 32], strides = [1, 1]} : vector<2x128xf32> to vector<2x32xf32>
    %35 = arith.mulf %32, %14 : vector<2x32xf32>
    %36 = arith.mulf %31, %33 : vector<2x32xf32>
    %37 = arith.addf %35, %36 : vector<2x32xf32>
    %38 = math.tanh %37 : vector<2x32xf32>
    %39 = arith.mulf %34, %38 : vector<2x32xf32>
    %cst_15 = arith.constant dense<0.000000e+00> : vector<2x128xf32>
    %40 = tpu.matmul %39, %3, %cst_15 {dimension_numbers = #tpu.dot_dimension_numbers<[1], [0], [0], [1], [0, 0, 1, 1], [], []>} : vector<2x32xf32>, vector<32x128xf32>, vector<2x128xf32> -> vector<2x128xf32>
    %cst_16 = arith.constant dense<0.000000e+00> : vector<2x128xf32>
    %41 = tpu.matmul %14, %4, %cst_16 {dimension_numbers = #tpu.dot_dimension_numbers<[1], [0], [0], [1], [0, 0, 1, 1], [], []>} : vector<2x32xf32>, vector<32x128xf32>, vector<2x128xf32> -> vector<2x128xf32>
    %42 = arith.addf %40, %41 : vector<2x128xf32>
    %43 = vector.broadcast %5 : vector<1x128xf32> to vector<2x128xf32>
    %44 = arith.addf %42, %43 : vector<2x128xf32>
    %45 = arith.negf %44 : vector<2x128xf32>
    %46 = math.exp %45 : vector<2x128xf32>
    %cst_17 = arith.constant 1.000000e+00 : f32
    %47 = vector.broadcast %cst_17 : f32 to vector<2x128xf32>
    %48 = arith.addf %47, %46 : vector<2x128xf32>
    %49 = arith.divf %47, %48 : vector<2x128xf32>
    %cst_18 = arith.constant 2.000000e+00 : f32
    %50 = vector.broadcast %cst_18 : f32 to vector<2x128xf32>
    %51 = arith.mulf %50, %49 : vector<2x128xf32>
    %cst_19 = arith.constant 1.000000e+00 : f32
    %52 = vector.broadcast %cst_19 : f32 to vector<2x128xf32>
    %53 = arith.subf %51, %52 : vector<2x128xf32>
    %54 = arith.select %13, %53, %49 : vector<2x128xi1>, vector<2x128xf32>
    %55 = vector.extract_strided_slice %54 {offsets = [0, 0], sizes = [2, 32], strides = [1, 1]} : vector<2x128xf32> to vector<2x32xf32>
    %56 = vector.extract_strided_slice %54 {offsets = [0, 32], sizes = [2, 32], strides = [1, 1]} : vector<2x128xf32> to vector<2x32xf32>
    %57 = vector.extract_strided_slice %54 {offsets = [0, 64], sizes = [2, 32], strides = [1, 1]} : vector<2x128xf32> to vector<2x32xf32>
    %58 = vector.extract_strided_slice %54 {offsets = [0, 96], sizes = [2, 32], strides = [1, 1]} : vector<2x128xf32> to vector<2x32xf32>
    %59 = arith.mulf %56, %14 : vector<2x32xf32>
    %60 = arith.mulf %55, %57 : vector<2x32xf32>
    %61 = arith.addf %59, %60 : vector<2x32xf32>
    %62 = math.tanh %61 : vector<2x32xf32>
    %63 = arith.mulf %58, %62 : vector<2x32xf32>
    %c0_20 = arith.constant 0 : index
    %c16_21 = arith.constant 16 : index
    %64 = vector.load %arg0[%c0_20, %c16_21] : memref<2x128xf32, #tpu.memory_space<vmem>>, vector<2x16xf32>
    %cst_22 = arith.constant dense<0.000000e+00> : vector<2x128xf32>
    %65 = tpu.matmul %64, %0, %cst_22 {dimension_numbers = #tpu.dot_dimension_numbers<[1], [0], [0], [1], [0, 0, 1, 1], [], []>} : vector<2x16xf32>, vector<16x128xf32>, vector<2x128xf32> -> vector<2x128xf32>
    %cst_23 = arith.constant dense<0.000000e+00> : vector<2x128xf32>
    %66 = tpu.matmul %39, %1, %cst_23 {dimension_numbers = #tpu.dot_dimension_numbers<[1], [0], [0], [1], [0, 0, 1, 1], [], []>} : vector<2x32xf32>, vector<32x128xf32>, vector<2x128xf32> -> vector<2x128xf32>
    %67 = arith.addf %65, %66 : vector<2x128xf32>
    %68 = vector.broadcast %2 : vector<1x128xf32> to vector<2x128xf32>
    %69 = arith.addf %67, %68 : vector<2x128xf32>
    %70 = arith.negf %69 : vector<2x128xf32>
    %71 = math.exp %70 : vector<2x128xf32>
    %cst_24 = arith.constant 1.000000e+00 : f32
    %72 = vector.broadcast %cst_24 : f32 to vector<2x128xf32>
    %73 = arith.addf %72, %71 : vector<2x128xf32>
    %74 = arith.divf %72, %73 : vector<2x128xf32>
    %cst_25 = arith.constant 2.000000e+00 : f32
    %75 = vector.broadcast %cst_25 : f32 to vector<2x128xf32>
    %76 = arith.mulf %75, %74 : vector<2x128xf32>
    %cst_26 = arith.constant 1.000000e+00 : f32
    %77 = vector.broadcast %cst_26 : f32 to vector<2x128xf32>
    %78 = arith.subf %76, %77 : vector<2x128xf32>
    %79 = arith.select %13, %78, %74 : vector<2x128xi1>, vector<2x128xf32>
    %80 = vector.extract_strided_slice %79 {offsets = [0, 0], sizes = [2, 32], strides = [1, 1]} : vector<2x128xf32> to vector<2x32xf32>
    %81 = vector.extract_strided_slice %79 {offsets = [0, 32], sizes = [2, 32], strides = [1, 1]} : vector<2x128xf32> to vector<2x32xf32>
    %82 = vector.extract_strided_slice %79 {offsets = [0, 64], sizes = [2, 32], strides = [1, 1]} : vector<2x128xf32> to vector<2x32xf32>
    %83 = vector.extract_strided_slice %79 {offsets = [0, 96], sizes = [2, 32], strides = [1, 1]} : vector<2x128xf32> to vector<2x32xf32>
    %84 = arith.mulf %81, %37 : vector<2x32xf32>
    %85 = arith.mulf %80, %82 : vector<2x32xf32>
    %86 = arith.addf %84, %85 : vector<2x32xf32>
    %87 = math.tanh %86 : vector<2x32xf32>
    %88 = arith.mulf %83, %87 : vector<2x32xf32>
    %cst_27 = arith.constant dense<0.000000e+00> : vector<2x128xf32>
    %89 = tpu.matmul %88, %3, %cst_27 {dimension_numbers = #tpu.dot_dimension_numbers<[1], [0], [0], [1], [0, 0, 1, 1], [], []>} : vector<2x32xf32>, vector<32x128xf32>, vector<2x128xf32> -> vector<2x128xf32>
    %cst_28 = arith.constant dense<0.000000e+00> : vector<2x128xf32>
    %90 = tpu.matmul %63, %4, %cst_28 {dimension_numbers = #tpu.dot_dimension_numbers<[1], [0], [0], [1], [0, 0, 1, 1], [], []>} : vector<2x32xf32>, vector<32x128xf32>, vector<2x128xf32> -> vector<2x128xf32>
    %91 = arith.addf %89, %90 : vector<2x128xf32>
    %92 = vector.broadcast %5 : vector<1x128xf32> to vector<2x128xf32>
    %93 = arith.addf %91, %92 : vector<2x128xf32>
    %94 = arith.negf %93 : vector<2x128xf32>
    %95 = math.exp %94 : vector<2x128xf32>
    %cst_29 = arith.constant 1.000000e+00 : f32
    %96 = vector.broadcast %cst_29 : f32 to vector<2x128xf32>
    %97 = arith.addf %96, %95 : vector<2x128xf32>
    %98 = arith.divf %96, %97 : vector<2x128xf32>
    %cst_30 = arith.constant 2.000000e+00 : f32
    %99 = vector.broadcast %cst_30 : f32 to vector<2x128xf32>
    %100 = arith.mulf %99, %98 : vector<2x128xf32>
    %cst_31 = arith.constant 1.000000e+00 : f32
    %101 = vector.broadcast %cst_31 : f32 to vector<2x128xf32>
    %102 = arith.subf %100, %101 : vector<2x128xf32>
    %103 = arith.select %13, %102, %98 : vector<2x128xi1>, vector<2x128xf32>
    %104 = vector.extract_strided_slice %103 {offsets = [0, 0], sizes = [2, 32], strides = [1, 1]} : vector<2x128xf32> to vector<2x32xf32>
    %105 = vector.extract_strided_slice %103 {offsets = [0, 32], sizes = [2, 32], strides = [1, 1]} : vector<2x128xf32> to vector<2x32xf32>
    %106 = vector.extract_strided_slice %103 {offsets = [0, 64], sizes = [2, 32], strides = [1, 1]} : vector<2x128xf32> to vector<2x32xf32>
    %107 = vector.extract_strided_slice %103 {offsets = [0, 96], sizes = [2, 32], strides = [1, 1]} : vector<2x128xf32> to vector<2x32xf32>
    %108 = arith.mulf %105, %61 : vector<2x32xf32>
    %109 = arith.mulf %104, %106 : vector<2x32xf32>
    %110 = arith.addf %108, %109 : vector<2x32xf32>
    %111 = math.tanh %110 : vector<2x32xf32>
    %112 = arith.mulf %107, %111 : vector<2x32xf32>
    %c0_32 = arith.constant 0 : index
    %c32 = arith.constant 32 : index
    %113 = vector.load %arg0[%c0_32, %c32] : memref<2x128xf32, #tpu.memory_space<vmem>>, vector<2x16xf32>
    %cst_33 = arith.constant dense<0.000000e+00> : vector<2x128xf32>
    %114 = tpu.matmul %113, %0, %cst_33 {dimension_numbers = #tpu.dot_dimension_numbers<[1], [0], [0], [1], [0, 0, 1, 1], [], []>} : vector<2x16xf32>, vector<16x128xf32>, vector<2x128xf32> -> vector<2x128xf32>
    %cst_34 = arith.constant dense<0.000000e+00> : vector<2x128xf32>
    %115 = tpu.matmul %88, %1, %cst_34 {dimension_numbers = #tpu.dot_dimension_numbers<[1], [0], [0], [1], [0, 0, 1, 1], [], []>} : vector<2x32xf32>, vector<32x128xf32>, vector<2x128xf32> -> vector<2x128xf32>
    %116 = arith.addf %114, %115 : vector<2x128xf32>
    %117 = vector.broadcast %2 : vector<1x128xf32> to vector<2x128xf32>
    %118 = arith.addf %116, %117 : vector<2x128xf32>
    %119 = arith.negf %118 : vector<2x128xf32>
    %120 = math.exp %119 : vector<2x128xf32>
    %cst_35 = arith.constant 1.000000e+00 : f32
    %121 = vector.broadcast %cst_35 : f32 to vector<2x128xf32>
    %122 = arith.addf %121, %120 : vector<2x128xf32>
    %123 = arith.divf %121, %122 : vector<2x128xf32>
    %cst_36 = arith.constant 2.000000e+00 : f32
    %124 = vector.broadcast %cst_36 : f32 to vector<2x128xf32>
    %125 = arith.mulf %124, %123 : vector<2x128xf32>
    %cst_37 = arith.constant 1.000000e+00 : f32
    %126 = vector.broadcast %cst_37 : f32 to vector<2x128xf32>
    %127 = arith.subf %125, %126 : vector<2x128xf32>
    %128 = arith.select %13, %127, %123 : vector<2x128xi1>, vector<2x128xf32>
    %129 = vector.extract_strided_slice %128 {offsets = [0, 0], sizes = [2, 32], strides = [1, 1]} : vector<2x128xf32> to vector<2x32xf32>
    %130 = vector.extract_strided_slice %128 {offsets = [0, 32], sizes = [2, 32], strides = [1, 1]} : vector<2x128xf32> to vector<2x32xf32>
    %131 = vector.extract_strided_slice %128 {offsets = [0, 64], sizes = [2, 32], strides = [1, 1]} : vector<2x128xf32> to vector<2x32xf32>
    %132 = vector.extract_strided_slice %128 {offsets = [0, 96], sizes = [2, 32], strides = [1, 1]} : vector<2x128xf32> to vector<2x32xf32>
    %133 = arith.mulf %130, %86 : vector<2x32xf32>
    %134 = arith.mulf %129, %131 : vector<2x32xf32>
    %135 = arith.addf %133, %134 : vector<2x32xf32>
    %136 = math.tanh %135 : vector<2x32xf32>
    %137 = arith.mulf %132, %136 : vector<2x32xf32>
    %cst_38 = arith.constant dense<0.000000e+00> : vector<2x128xf32>
    %138 = tpu.matmul %137, %3, %cst_38 {dimension_numbers = #tpu.dot_dimension_numbers<[1], [0], [0], [1], [0, 0, 1, 1], [], []>} : vector<2x32xf32>, vector<32x128xf32>, vector<2x128xf32> -> vector<2x128xf32>
    %cst_39 = arith.constant dense<0.000000e+00> : vector<2x128xf32>
    %139 = tpu.matmul %112, %4, %cst_39 {dimension_numbers = #tpu.dot_dimension_numbers<[1], [0], [0], [1], [0, 0, 1, 1], [], []>} : vector<2x32xf32>, vector<32x128xf32>, vector<2x128xf32> -> vector<2x128xf32>
    %140 = arith.addf %138, %139 : vector<2x128xf32>
    %141 = vector.broadcast %5 : vector<1x128xf32> to vector<2x128xf32>
    %142 = arith.addf %140, %141 : vector<2x128xf32>
    %143 = arith.negf %142 : vector<2x128xf32>
    %144 = math.exp %143 : vector<2x128xf32>
    %cst_40 = arith.constant 1.000000e+00 : f32
    %145 = vector.broadcast %cst_40 : f32 to vector<2x128xf32>
    %146 = arith.addf %145, %144 : vector<2x128xf32>
    %147 = arith.divf %145, %146 : vector<2x128xf32>
    %cst_41 = arith.constant 2.000000e+00 : f32
    %148 = vector.broadcast %cst_41 : f32 to vector<2x128xf32>
    %149 = arith.mulf %148, %147 : vector<2x128xf32>
    %cst_42 = arith.constant 1.000000e+00 : f32
    %150 = vector.broadcast %cst_42 : f32 to vector<2x128xf32>
    %151 = arith.subf %149, %150 : vector<2x128xf32>
    %152 = arith.select %13, %151, %147 : vector<2x128xi1>, vector<2x128xf32>
    %153 = vector.extract_strided_slice %152 {offsets = [0, 0], sizes = [2, 32], strides = [1, 1]} : vector<2x128xf32> to vector<2x32xf32>
    %154 = vector.extract_strided_slice %152 {offsets = [0, 32], sizes = [2, 32], strides = [1, 1]} : vector<2x128xf32> to vector<2x32xf32>
    %155 = vector.extract_strided_slice %152 {offsets = [0, 64], sizes = [2, 32], strides = [1, 1]} : vector<2x128xf32> to vector<2x32xf32>
    %156 = vector.extract_strided_slice %152 {offsets = [0, 96], sizes = [2, 32], strides = [1, 1]} : vector<2x128xf32> to vector<2x32xf32>
    %157 = arith.mulf %154, %110 : vector<2x32xf32>
    %158 = arith.mulf %153, %155 : vector<2x32xf32>
    %159 = arith.addf %157, %158 : vector<2x32xf32>
    %160 = math.tanh %159 : vector<2x32xf32>
    %161 = arith.mulf %156, %160 : vector<2x32xf32>
    %c0_43 = arith.constant 0 : index
    %c48_44 = arith.constant 48 : index
    %162 = vector.load %arg0[%c0_43, %c48_44] : memref<2x128xf32, #tpu.memory_space<vmem>>, vector<2x16xf32>
    %cst_45 = arith.constant dense<0.000000e+00> : vector<2x128xf32>
    %163 = tpu.matmul %162, %0, %cst_45 {dimension_numbers = #tpu.dot_dimension_numbers<[1], [0], [0], [1], [0, 0, 1, 1], [], []>} : vector<2x16xf32>, vector<16x128xf32>, vector<2x128xf32> -> vector<2x128xf32>
    %cst_46 = arith.constant dense<0.000000e+00> : vector<2x128xf32>
    %164 = tpu.matmul %137, %1, %cst_46 {dimension_numbers = #tpu.dot_dimension_numbers<[1], [0], [0], [1], [0, 0, 1, 1], [], []>} : vector<2x32xf32>, vector<32x128xf32>, vector<2x128xf32> -> vector<2x128xf32>
    %165 = arith.addf %163, %164 : vector<2x128xf32>
    %166 = vector.broadcast %2 : vector<1x128xf32> to vector<2x128xf32>
    %167 = arith.addf %165, %166 : vector<2x128xf32>
    %168 = arith.negf %167 : vector<2x128xf32>
    %169 = math.exp %168 : vector<2x128xf32>
    %cst_47 = arith.constant 1.000000e+00 : f32
    %170 = vector.broadcast %cst_47 : f32 to vector<2x128xf32>
    %171 = arith.addf %170, %169 : vector<2x128xf32>
    %172 = arith.divf %170, %171 : vector<2x128xf32>
    %cst_48 = arith.constant 2.000000e+00 : f32
    %173 = vector.broadcast %cst_48 : f32 to vector<2x128xf32>
    %174 = arith.mulf %173, %172 : vector<2x128xf32>
    %cst_49 = arith.constant 1.000000e+00 : f32
    %175 = vector.broadcast %cst_49 : f32 to vector<2x128xf32>
    %176 = arith.subf %174, %175 : vector<2x128xf32>
    %177 = arith.select %13, %176, %172 : vector<2x128xi1>, vector<2x128xf32>
    %178 = vector.extract_strided_slice %177 {offsets = [0, 0], sizes = [2, 32], strides = [1, 1]} : vector<2x128xf32> to vector<2x32xf32>
    %179 = vector.extract_strided_slice %177 {offsets = [0, 32], sizes = [2, 32], strides = [1, 1]} : vector<2x128xf32> to vector<2x32xf32>
    %180 = vector.extract_strided_slice %177 {offsets = [0, 64], sizes = [2, 32], strides = [1, 1]} : vector<2x128xf32> to vector<2x32xf32>
    %181 = vector.extract_strided_slice %177 {offsets = [0, 96], sizes = [2, 32], strides = [1, 1]} : vector<2x128xf32> to vector<2x32xf32>
    %182 = arith.mulf %179, %135 : vector<2x32xf32>
    %183 = arith.mulf %178, %180 : vector<2x32xf32>
    %184 = arith.addf %182, %183 : vector<2x32xf32>
    %185 = math.tanh %184 : vector<2x32xf32>
    %186 = arith.mulf %181, %185 : vector<2x32xf32>
    %cst_50 = arith.constant dense<0.000000e+00> : vector<2x128xf32>
    %187 = tpu.matmul %186, %3, %cst_50 {dimension_numbers = #tpu.dot_dimension_numbers<[1], [0], [0], [1], [0, 0, 1, 1], [], []>} : vector<2x32xf32>, vector<32x128xf32>, vector<2x128xf32> -> vector<2x128xf32>
    %cst_51 = arith.constant dense<0.000000e+00> : vector<2x128xf32>
    %188 = tpu.matmul %161, %4, %cst_51 {dimension_numbers = #tpu.dot_dimension_numbers<[1], [0], [0], [1], [0, 0, 1, 1], [], []>} : vector<2x32xf32>, vector<32x128xf32>, vector<2x128xf32> -> vector<2x128xf32>
    %189 = arith.addf %187, %188 : vector<2x128xf32>
    %190 = vector.broadcast %5 : vector<1x128xf32> to vector<2x128xf32>
    %191 = arith.addf %189, %190 : vector<2x128xf32>
    %192 = arith.negf %191 : vector<2x128xf32>
    %193 = math.exp %192 : vector<2x128xf32>
    %cst_52 = arith.constant 1.000000e+00 : f32
    %194 = vector.broadcast %cst_52 : f32 to vector<2x128xf32>
    %195 = arith.addf %194, %193 : vector<2x128xf32>
    %196 = arith.divf %194, %195 : vector<2x128xf32>
    %cst_53 = arith.constant 2.000000e+00 : f32
    %197 = vector.broadcast %cst_53 : f32 to vector<2x128xf32>
    %198 = arith.mulf %197, %196 : vector<2x128xf32>
    %cst_54 = arith.constant 1.000000e+00 : f32
    %199 = vector.broadcast %cst_54 : f32 to vector<2x128xf32>
    %200 = arith.subf %198, %199 : vector<2x128xf32>
    %201 = arith.select %13, %200, %196 : vector<2x128xi1>, vector<2x128xf32>
    %202 = vector.extract_strided_slice %201 {offsets = [0, 0], sizes = [2, 32], strides = [1, 1]} : vector<2x128xf32> to vector<2x32xf32>
    %203 = vector.extract_strided_slice %201 {offsets = [0, 32], sizes = [2, 32], strides = [1, 1]} : vector<2x128xf32> to vector<2x32xf32>
    %204 = vector.extract_strided_slice %201 {offsets = [0, 64], sizes = [2, 32], strides = [1, 1]} : vector<2x128xf32> to vector<2x32xf32>
    %205 = vector.extract_strided_slice %201 {offsets = [0, 96], sizes = [2, 32], strides = [1, 1]} : vector<2x128xf32> to vector<2x32xf32>
    %206 = arith.mulf %203, %159 : vector<2x32xf32>
    %207 = arith.mulf %202, %204 : vector<2x32xf32>
    %208 = arith.addf %206, %207 : vector<2x32xf32>
    %209 = math.tanh %208 : vector<2x32xf32>
    %210 = arith.mulf %205, %209 : vector<2x32xf32>
    %c0_55 = arith.constant 0 : index
    %c64 = arith.constant 64 : index
    %211 = vector.load %arg0[%c0_55, %c64] : memref<2x128xf32, #tpu.memory_space<vmem>>, vector<2x16xf32>
    %cst_56 = arith.constant dense<0.000000e+00> : vector<2x128xf32>
    %212 = tpu.matmul %211, %0, %cst_56 {dimension_numbers = #tpu.dot_dimension_numbers<[1], [0], [0], [1], [0, 0, 1, 1], [], []>} : vector<2x16xf32>, vector<16x128xf32>, vector<2x128xf32> -> vector<2x128xf32>
    %cst_57 = arith.constant dense<0.000000e+00> : vector<2x128xf32>
    %213 = tpu.matmul %186, %1, %cst_57 {dimension_numbers = #tpu.dot_dimension_numbers<[1], [0], [0], [1], [0, 0, 1, 1], [], []>} : vector<2x32xf32>, vector<32x128xf32>, vector<2x128xf32> -> vector<2x128xf32>
    %214 = arith.addf %212, %213 : vector<2x128xf32>
    %215 = vector.broadcast %2 : vector<1x128xf32> to vector<2x128xf32>
    %216 = arith.addf %214, %215 : vector<2x128xf32>
    %217 = arith.negf %216 : vector<2x128xf32>
    %218 = math.exp %217 : vector<2x128xf32>
    %cst_58 = arith.constant 1.000000e+00 : f32
    %219 = vector.broadcast %cst_58 : f32 to vector<2x128xf32>
    %220 = arith.addf %219, %218 : vector<2x128xf32>
    %221 = arith.divf %219, %220 : vector<2x128xf32>
    %cst_59 = arith.constant 2.000000e+00 : f32
    %222 = vector.broadcast %cst_59 : f32 to vector<2x128xf32>
    %223 = arith.mulf %222, %221 : vector<2x128xf32>
    %cst_60 = arith.constant 1.000000e+00 : f32
    %224 = vector.broadcast %cst_60 : f32 to vector<2x128xf32>
    %225 = arith.subf %223, %224 : vector<2x128xf32>
    %226 = arith.select %13, %225, %221 : vector<2x128xi1>, vector<2x128xf32>
    %227 = vector.extract_strided_slice %226 {offsets = [0, 0], sizes = [2, 32], strides = [1, 1]} : vector<2x128xf32> to vector<2x32xf32>
    %228 = vector.extract_strided_slice %226 {offsets = [0, 32], sizes = [2, 32], strides = [1, 1]} : vector<2x128xf32> to vector<2x32xf32>
    %229 = vector.extract_strided_slice %226 {offsets = [0, 64], sizes = [2, 32], strides = [1, 1]} : vector<2x128xf32> to vector<2x32xf32>
    %230 = vector.extract_strided_slice %226 {offsets = [0, 96], sizes = [2, 32], strides = [1, 1]} : vector<2x128xf32> to vector<2x32xf32>
    %231 = arith.mulf %228, %184 : vector<2x32xf32>
    %232 = arith.mulf %227, %229 : vector<2x32xf32>
    %233 = arith.addf %231, %232 : vector<2x32xf32>
    %234 = math.tanh %233 : vector<2x32xf32>
    %235 = arith.mulf %230, %234 : vector<2x32xf32>
    %cst_61 = arith.constant dense<0.000000e+00> : vector<2x128xf32>
    %236 = tpu.matmul %235, %3, %cst_61 {dimension_numbers = #tpu.dot_dimension_numbers<[1], [0], [0], [1], [0, 0, 1, 1], [], []>} : vector<2x32xf32>, vector<32x128xf32>, vector<2x128xf32> -> vector<2x128xf32>
    %cst_62 = arith.constant dense<0.000000e+00> : vector<2x128xf32>
    %237 = tpu.matmul %210, %4, %cst_62 {dimension_numbers = #tpu.dot_dimension_numbers<[1], [0], [0], [1], [0, 0, 1, 1], [], []>} : vector<2x32xf32>, vector<32x128xf32>, vector<2x128xf32> -> vector<2x128xf32>
    %238 = arith.addf %236, %237 : vector<2x128xf32>
    %239 = vector.broadcast %5 : vector<1x128xf32> to vector<2x128xf32>
    %240 = arith.addf %238, %239 : vector<2x128xf32>
    %241 = arith.negf %240 : vector<2x128xf32>
    %242 = math.exp %241 : vector<2x128xf32>
    %cst_63 = arith.constant 1.000000e+00 : f32
    %243 = vector.broadcast %cst_63 : f32 to vector<2x128xf32>
    %244 = arith.addf %243, %242 : vector<2x128xf32>
    %245 = arith.divf %243, %244 : vector<2x128xf32>
    %cst_64 = arith.constant 2.000000e+00 : f32
    %246 = vector.broadcast %cst_64 : f32 to vector<2x128xf32>
    %247 = arith.mulf %246, %245 : vector<2x128xf32>
    %cst_65 = arith.constant 1.000000e+00 : f32
    %248 = vector.broadcast %cst_65 : f32 to vector<2x128xf32>
    %249 = arith.subf %247, %248 : vector<2x128xf32>
    %250 = arith.select %13, %249, %245 : vector<2x128xi1>, vector<2x128xf32>
    %251 = vector.extract_strided_slice %250 {offsets = [0, 0], sizes = [2, 32], strides = [1, 1]} : vector<2x128xf32> to vector<2x32xf32>
    %252 = vector.extract_strided_slice %250 {offsets = [0, 32], sizes = [2, 32], strides = [1, 1]} : vector<2x128xf32> to vector<2x32xf32>
    %253 = vector.extract_strided_slice %250 {offsets = [0, 64], sizes = [2, 32], strides = [1, 1]} : vector<2x128xf32> to vector<2x32xf32>
    %254 = vector.extract_strided_slice %250 {offsets = [0, 96], sizes = [2, 32], strides = [1, 1]} : vector<2x128xf32> to vector<2x32xf32>
    %255 = arith.mulf %252, %208 : vector<2x32xf32>
    %256 = arith.mulf %251, %253 : vector<2x32xf32>
    %257 = arith.addf %255, %256 : vector<2x32xf32>
    %258 = math.tanh %257 : vector<2x32xf32>
    %259 = arith.mulf %254, %258 : vector<2x32xf32>
    %c0_66 = arith.constant 0 : index
    %c80 = arith.constant 80 : index
    %260 = vector.load %arg0[%c0_66, %c80] : memref<2x128xf32, #tpu.memory_space<vmem>>, vector<2x16xf32>
    %cst_67 = arith.constant dense<0.000000e+00> : vector<2x128xf32>
    %261 = tpu.matmul %260, %0, %cst_67 {dimension_numbers = #tpu.dot_dimension_numbers<[1], [0], [0], [1], [0, 0, 1, 1], [], []>} : vector<2x16xf32>, vector<16x128xf32>, vector<2x128xf32> -> vector<2x128xf32>
    %cst_68 = arith.constant dense<0.000000e+00> : vector<2x128xf32>
    %262 = tpu.matmul %235, %1, %cst_68 {dimension_numbers = #tpu.dot_dimension_numbers<[1], [0], [0], [1], [0, 0, 1, 1], [], []>} : vector<2x32xf32>, vector<32x128xf32>, vector<2x128xf32> -> vector<2x128xf32>
    %263 = arith.addf %261, %262 : vector<2x128xf32>
    %264 = vector.broadcast %2 : vector<1x128xf32> to vector<2x128xf32>
    %265 = arith.addf %263, %264 : vector<2x128xf32>
    %266 = arith.negf %265 : vector<2x128xf32>
    %267 = math.exp %266 : vector<2x128xf32>
    %cst_69 = arith.constant 1.000000e+00 : f32
    %268 = vector.broadcast %cst_69 : f32 to vector<2x128xf32>
    %269 = arith.addf %268, %267 : vector<2x128xf32>
    %270 = arith.divf %268, %269 : vector<2x128xf32>
    %cst_70 = arith.constant 2.000000e+00 : f32
    %271 = vector.broadcast %cst_70 : f32 to vector<2x128xf32>
    %272 = arith.mulf %271, %270 : vector<2x128xf32>
    %cst_71 = arith.constant 1.000000e+00 : f32
    %273 = vector.broadcast %cst_71 : f32 to vector<2x128xf32>
    %274 = arith.subf %272, %273 : vector<2x128xf32>
    %275 = arith.select %13, %274, %270 : vector<2x128xi1>, vector<2x128xf32>
    %276 = vector.extract_strided_slice %275 {offsets = [0, 0], sizes = [2, 32], strides = [1, 1]} : vector<2x128xf32> to vector<2x32xf32>
    %277 = vector.extract_strided_slice %275 {offsets = [0, 32], sizes = [2, 32], strides = [1, 1]} : vector<2x128xf32> to vector<2x32xf32>
    %278 = vector.extract_strided_slice %275 {offsets = [0, 64], sizes = [2, 32], strides = [1, 1]} : vector<2x128xf32> to vector<2x32xf32>
    %279 = vector.extract_strided_slice %275 {offsets = [0, 96], sizes = [2, 32], strides = [1, 1]} : vector<2x128xf32> to vector<2x32xf32>
    %280 = arith.mulf %277, %233 : vector<2x32xf32>
    %281 = arith.mulf %276, %278 : vector<2x32xf32>
    %282 = arith.addf %280, %281 : vector<2x32xf32>
    %283 = math.tanh %282 : vector<2x32xf32>
    %284 = arith.mulf %279, %283 : vector<2x32xf32>
    %cst_72 = arith.constant dense<0.000000e+00> : vector<2x128xf32>
    %285 = tpu.matmul %284, %3, %cst_72 {dimension_numbers = #tpu.dot_dimension_numbers<[1], [0], [0], [1], [0, 0, 1, 1], [], []>} : vector<2x32xf32>, vector<32x128xf32>, vector<2x128xf32> -> vector<2x128xf32>
    %cst_73 = arith.constant dense<0.000000e+00> : vector<2x128xf32>
    %286 = tpu.matmul %259, %4, %cst_73 {dimension_numbers = #tpu.dot_dimension_numbers<[1], [0], [0], [1], [0, 0, 1, 1], [], []>} : vector<2x32xf32>, vector<32x128xf32>, vector<2x128xf32> -> vector<2x128xf32>
    %287 = arith.addf %285, %286 : vector<2x128xf32>
    %288 = vector.broadcast %5 : vector<1x128xf32> to vector<2x128xf32>
    %289 = arith.addf %287, %288 : vector<2x128xf32>
    %290 = arith.negf %289 : vector<2x128xf32>
    %291 = math.exp %290 : vector<2x128xf32>
    %cst_74 = arith.constant 1.000000e+00 : f32
    %292 = vector.broadcast %cst_74 : f32 to vector<2x128xf32>
    %293 = arith.addf %292, %291 : vector<2x128xf32>
    %294 = arith.divf %292, %293 : vector<2x128xf32>
    %cst_75 = arith.constant 2.000000e+00 : f32
    %295 = vector.broadcast %cst_75 : f32 to vector<2x128xf32>
    %296 = arith.mulf %295, %294 : vector<2x128xf32>
    %cst_76 = arith.constant 1.000000e+00 : f32
    %297 = vector.broadcast %cst_76 : f32 to vector<2x128xf32>
    %298 = arith.subf %296, %297 : vector<2x128xf32>
    %299 = arith.select %13, %298, %294 : vector<2x128xi1>, vector<2x128xf32>
    %300 = vector.extract_strided_slice %299 {offsets = [0, 0], sizes = [2, 32], strides = [1, 1]} : vector<2x128xf32> to vector<2x32xf32>
    %301 = vector.extract_strided_slice %299 {offsets = [0, 32], sizes = [2, 32], strides = [1, 1]} : vector<2x128xf32> to vector<2x32xf32>
    %302 = vector.extract_strided_slice %299 {offsets = [0, 64], sizes = [2, 32], strides = [1, 1]} : vector<2x128xf32> to vector<2x32xf32>
    %303 = vector.extract_strided_slice %299 {offsets = [0, 96], sizes = [2, 32], strides = [1, 1]} : vector<2x128xf32> to vector<2x32xf32>
    %304 = arith.mulf %301, %257 : vector<2x32xf32>
    %305 = arith.mulf %300, %302 : vector<2x32xf32>
    %306 = arith.addf %304, %305 : vector<2x32xf32>
    %307 = math.tanh %306 : vector<2x32xf32>
    %308 = arith.mulf %303, %307 : vector<2x32xf32>
    %c0_77 = arith.constant 0 : index
    %c96 = arith.constant 96 : index
    %309 = vector.load %arg0[%c0_77, %c96] : memref<2x128xf32, #tpu.memory_space<vmem>>, vector<2x16xf32>
    %cst_78 = arith.constant dense<0.000000e+00> : vector<2x128xf32>
    %310 = tpu.matmul %309, %0, %cst_78 {dimension_numbers = #tpu.dot_dimension_numbers<[1], [0], [0], [1], [0, 0, 1, 1], [], []>} : vector<2x16xf32>, vector<16x128xf32>, vector<2x128xf32> -> vector<2x128xf32>
    %cst_79 = arith.constant dense<0.000000e+00> : vector<2x128xf32>
    %311 = tpu.matmul %284, %1, %cst_79 {dimension_numbers = #tpu.dot_dimension_numbers<[1], [0], [0], [1], [0, 0, 1, 1], [], []>} : vector<2x32xf32>, vector<32x128xf32>, vector<2x128xf32> -> vector<2x128xf32>
    %312 = arith.addf %310, %311 : vector<2x128xf32>
    %313 = vector.broadcast %2 : vector<1x128xf32> to vector<2x128xf32>
    %314 = arith.addf %312, %313 : vector<2x128xf32>
    %315 = arith.negf %314 : vector<2x128xf32>
    %316 = math.exp %315 : vector<2x128xf32>
    %cst_80 = arith.constant 1.000000e+00 : f32
    %317 = vector.broadcast %cst_80 : f32 to vector<2x128xf32>
    %318 = arith.addf %317, %316 : vector<2x128xf32>
    %319 = arith.divf %317, %318 : vector<2x128xf32>
    %cst_81 = arith.constant 2.000000e+00 : f32
    %320 = vector.broadcast %cst_81 : f32 to vector<2x128xf32>
    %321 = arith.mulf %320, %319 : vector<2x128xf32>
    %cst_82 = arith.constant 1.000000e+00 : f32
    %322 = vector.broadcast %cst_82 : f32 to vector<2x128xf32>
    %323 = arith.subf %321, %322 : vector<2x128xf32>
    %324 = arith.select %13, %323, %319 : vector<2x128xi1>, vector<2x128xf32>
    %325 = vector.extract_strided_slice %324 {offsets = [0, 0], sizes = [2, 32], strides = [1, 1]} : vector<2x128xf32> to vector<2x32xf32>
    %326 = vector.extract_strided_slice %324 {offsets = [0, 32], sizes = [2, 32], strides = [1, 1]} : vector<2x128xf32> to vector<2x32xf32>
    %327 = vector.extract_strided_slice %324 {offsets = [0, 64], sizes = [2, 32], strides = [1, 1]} : vector<2x128xf32> to vector<2x32xf32>
    %328 = vector.extract_strided_slice %324 {offsets = [0, 96], sizes = [2, 32], strides = [1, 1]} : vector<2x128xf32> to vector<2x32xf32>
    %329 = arith.mulf %326, %282 : vector<2x32xf32>
    %330 = arith.mulf %325, %327 : vector<2x32xf32>
    %331 = arith.addf %329, %330 : vector<2x32xf32>
    %332 = math.tanh %331 : vector<2x32xf32>
    %333 = arith.mulf %328, %332 : vector<2x32xf32>
    %cst_83 = arith.constant dense<0.000000e+00> : vector<2x128xf32>
    %334 = tpu.matmul %333, %3, %cst_83 {dimension_numbers = #tpu.dot_dimension_numbers<[1], [0], [0], [1], [0, 0, 1, 1], [], []>} : vector<2x32xf32>, vector<32x128xf32>, vector<2x128xf32> -> vector<2x128xf32>
    %cst_84 = arith.constant dense<0.000000e+00> : vector<2x128xf32>
    %335 = tpu.matmul %308, %4, %cst_84 {dimension_numbers = #tpu.dot_dimension_numbers<[1], [0], [0], [1], [0, 0, 1, 1], [], []>} : vector<2x32xf32>, vector<32x128xf32>, vector<2x128xf32> -> vector<2x128xf32>
    %336 = arith.addf %334, %335 : vector<2x128xf32>
    %337 = vector.broadcast %5 : vector<1x128xf32> to vector<2x128xf32>
    %338 = arith.addf %336, %337 : vector<2x128xf32>
    %339 = arith.negf %338 : vector<2x128xf32>
    %340 = math.exp %339 : vector<2x128xf32>
    %cst_85 = arith.constant 1.000000e+00 : f32
    %341 = vector.broadcast %cst_85 : f32 to vector<2x128xf32>
    %342 = arith.addf %341, %340 : vector<2x128xf32>
    %343 = arith.divf %341, %342 : vector<2x128xf32>
    %cst_86 = arith.constant 2.000000e+00 : f32
    %344 = vector.broadcast %cst_86 : f32 to vector<2x128xf32>
    %345 = arith.mulf %344, %343 : vector<2x128xf32>
    %cst_87 = arith.constant 1.000000e+00 : f32
    %346 = vector.broadcast %cst_87 : f32 to vector<2x128xf32>
    %347 = arith.subf %345, %346 : vector<2x128xf32>
    %348 = arith.select %13, %347, %343 : vector<2x128xi1>, vector<2x128xf32>
    %349 = vector.extract_strided_slice %348 {offsets = [0, 0], sizes = [2, 32], strides = [1, 1]} : vector<2x128xf32> to vector<2x32xf32>
    %350 = vector.extract_strided_slice %348 {offsets = [0, 32], sizes = [2, 32], strides = [1, 1]} : vector<2x128xf32> to vector<2x32xf32>
    %351 = vector.extract_strided_slice %348 {offsets = [0, 64], sizes = [2, 32], strides = [1, 1]} : vector<2x128xf32> to vector<2x32xf32>
    %352 = vector.extract_strided_slice %348 {offsets = [0, 96], sizes = [2, 32], strides = [1, 1]} : vector<2x128xf32> to vector<2x32xf32>
    %353 = arith.mulf %350, %306 : vector<2x32xf32>
    %354 = arith.mulf %349, %351 : vector<2x32xf32>
    %355 = arith.addf %353, %354 : vector<2x32xf32>
    %356 = math.tanh %355 : vector<2x32xf32>
    %357 = arith.mulf %352, %356 : vector<2x32xf32>
    %c0_88 = arith.constant 0 : index
    %c112 = arith.constant 112 : index
    %358 = vector.load %arg0[%c0_88, %c112] : memref<2x128xf32, #tpu.memory_space<vmem>>, vector<2x16xf32>
    %cst_89 = arith.constant dense<0.000000e+00> : vector<2x128xf32>
    %359 = tpu.matmul %358, %0, %cst_89 {dimension_numbers = #tpu.dot_dimension_numbers<[1], [0], [0], [1], [0, 0, 1, 1], [], []>} : vector<2x16xf32>, vector<16x128xf32>, vector<2x128xf32> -> vector<2x128xf32>
    %cst_90 = arith.constant dense<0.000000e+00> : vector<2x128xf32>
    %360 = tpu.matmul %333, %1, %cst_90 {dimension_numbers = #tpu.dot_dimension_numbers<[1], [0], [0], [1], [0, 0, 1, 1], [], []>} : vector<2x32xf32>, vector<32x128xf32>, vector<2x128xf32> -> vector<2x128xf32>
    %361 = arith.addf %359, %360 : vector<2x128xf32>
    %362 = vector.broadcast %2 : vector<1x128xf32> to vector<2x128xf32>
    %363 = arith.addf %361, %362 : vector<2x128xf32>
    %364 = arith.negf %363 : vector<2x128xf32>
    %365 = math.exp %364 : vector<2x128xf32>
    %cst_91 = arith.constant 1.000000e+00 : f32
    %366 = vector.broadcast %cst_91 : f32 to vector<2x128xf32>
    %367 = arith.addf %366, %365 : vector<2x128xf32>
    %368 = arith.divf %366, %367 : vector<2x128xf32>
    %cst_92 = arith.constant 2.000000e+00 : f32
    %369 = vector.broadcast %cst_92 : f32 to vector<2x128xf32>
    %370 = arith.mulf %369, %368 : vector<2x128xf32>
    %cst_93 = arith.constant 1.000000e+00 : f32
    %371 = vector.broadcast %cst_93 : f32 to vector<2x128xf32>
    %372 = arith.subf %370, %371 : vector<2x128xf32>
    %373 = arith.select %13, %372, %368 : vector<2x128xi1>, vector<2x128xf32>
    %374 = vector.extract_strided_slice %373 {offsets = [0, 0], sizes = [2, 32], strides = [1, 1]} : vector<2x128xf32> to vector<2x32xf32>
    %375 = vector.extract_strided_slice %373 {offsets = [0, 32], sizes = [2, 32], strides = [1, 1]} : vector<2x128xf32> to vector<2x32xf32>
    %376 = vector.extract_strided_slice %373 {offsets = [0, 64], sizes = [2, 32], strides = [1, 1]} : vector<2x128xf32> to vector<2x32xf32>
    %377 = vector.extract_strided_slice %373 {offsets = [0, 96], sizes = [2, 32], strides = [1, 1]} : vector<2x128xf32> to vector<2x32xf32>
    %378 = arith.mulf %375, %331 : vector<2x32xf32>
    %379 = arith.mulf %374, %376 : vector<2x32xf32>
    %380 = arith.addf %378, %379 : vector<2x32xf32>
    %381 = math.tanh %380 : vector<2x32xf32>
    %382 = arith.mulf %377, %381 : vector<2x32xf32>
    %cst_94 = arith.constant dense<0.000000e+00> : vector<2x128xf32>
    %383 = tpu.matmul %382, %3, %cst_94 {dimension_numbers = #tpu.dot_dimension_numbers<[1], [0], [0], [1], [0, 0, 1, 1], [], []>} : vector<2x32xf32>, vector<32x128xf32>, vector<2x128xf32> -> vector<2x128xf32>
    %cst_95 = arith.constant dense<0.000000e+00> : vector<2x128xf32>
    %384 = tpu.matmul %357, %4, %cst_95 {dimension_numbers = #tpu.dot_dimension_numbers<[1], [0], [0], [1], [0, 0, 1, 1], [], []>} : vector<2x32xf32>, vector<32x128xf32>, vector<2x128xf32> -> vector<2x128xf32>
    %385 = arith.addf %383, %384 : vector<2x128xf32>
    %386 = vector.broadcast %5 : vector<1x128xf32> to vector<2x128xf32>
    %387 = arith.addf %385, %386 : vector<2x128xf32>
    %388 = arith.negf %387 : vector<2x128xf32>
    %389 = math.exp %388 : vector<2x128xf32>
    %cst_96 = arith.constant 1.000000e+00 : f32
    %390 = vector.broadcast %cst_96 : f32 to vector<2x128xf32>
    %391 = arith.addf %390, %389 : vector<2x128xf32>
    %392 = arith.divf %390, %391 : vector<2x128xf32>
    %cst_97 = arith.constant 2.000000e+00 : f32
    %393 = vector.broadcast %cst_97 : f32 to vector<2x128xf32>
    %394 = arith.mulf %393, %392 : vector<2x128xf32>
    %cst_98 = arith.constant 1.000000e+00 : f32
    %395 = vector.broadcast %cst_98 : f32 to vector<2x128xf32>
    %396 = arith.subf %394, %395 : vector<2x128xf32>
    %397 = arith.select %13, %396, %392 : vector<2x128xi1>, vector<2x128xf32>
    %398 = vector.extract_strided_slice %397 {offsets = [0, 0], sizes = [2, 32], strides = [1, 1]} : vector<2x128xf32> to vector<2x32xf32>
    %399 = vector.extract_strided_slice %397 {offsets = [0, 32], sizes = [2, 32], strides = [1, 1]} : vector<2x128xf32> to vector<2x32xf32>
    %400 = vector.extract_strided_slice %397 {offsets = [0, 64], sizes = [2, 32], strides = [1, 1]} : vector<2x128xf32> to vector<2x32xf32>
    %401 = vector.extract_strided_slice %397 {offsets = [0, 96], sizes = [2, 32], strides = [1, 1]} : vector<2x128xf32> to vector<2x32xf32>
    %402 = arith.mulf %399, %355 : vector<2x32xf32>
    %403 = arith.mulf %398, %400 : vector<2x32xf32>
    %404 = arith.addf %402, %403 : vector<2x32xf32>
    %405 = math.tanh %404 : vector<2x32xf32>
    %406 = arith.mulf %401, %405 : vector<2x32xf32>
    %cst_99 = arith.constant dense<0.000000e+00> : vector<2x128xf32>
    %407 = tpu.matmul %406, %6, %cst_99 {dimension_numbers = #tpu.dot_dimension_numbers<[1], [0], [0], [1], [0, 0, 1, 1], [], []>} : vector<2x32xf32>, vector<32x128xf32>, vector<2x128xf32> -> vector<2x128xf32>
    %408 = vector.broadcast %7 : vector<1x128xf32> to vector<2x128xf32>
    %409 = arith.addf %407, %408 : vector<2x128xf32>
    %410 = vector.extract_strided_slice %409 {offsets = [0, 0], sizes = [2, 8], strides = [1, 1]} : vector<2x128xf32> to vector<2x8xf32>
    %c0_100 = arith.constant 0 : index
    %c0_101 = arith.constant 0 : index
    %411 = vector.load %arg2[%c0_100, %c0_101] : memref<2x8xf32, #tpu.memory_space<vmem>>, vector<2x8xf32>
    tpu.vector_store %arg2[%c0_100, %c0_101], %410 {strides = array<i32>} : memref<2x8xf32, #tpu.memory_space<vmem>>, vector<2x8xf32>,
    return
  }
}

</mosaic_0001>

<bundles_post_ra>
// kernel: forward.1
= control target key start
LH: loop header
LB: loop body
LE: loop exit
PB: predicated region body
PF: predicated region fallthrough
CT: control target
= control target key end

     0   :  { %7 = vsyncpa [#allocation3], 0  ;;  %s4265_s0 = inlined_call_operand.vmem [shape: f32[2,128], index: 0, kind: input, shape index: {}]   ;;  %s4266_s1 = inlined_call_operand.hbm [shape: f32[168,128], index: 1, kind: input, shape index: {}]   ;;  %s4267_s2 = inlined_call_operand.hbm [shape: f32[2,8], index: 2, kind: output, shape index: {}]  }
   0x1   :  { %8 = vsyncpa [#allocation4], 0  ;;  %s3656_s9 = smov [#allocation2]  }
   0x2   :  { %s16_s10 = sshll.u32 %s3656_s9, 4  ;;  %s17_s10 = int_to_ptr.vmem [resolvable:$true] %s16_s10 }
   0x3   :  { %s3620_s11 = scalar_lea.vmem %s17_s10, 2688  ;;  %p3625_p1 = scmp.lt.s32.totalorder %s17_s10, %s17_s10 }
   0x4   :  { %p3621_p0 = scmp.ne.s32.totalorder %s17_s10, %s3620_s11  ;;  %p3626_p2 = scmp.lt.s32.totalorder %s3620_s11, %s3620_s11 }
   0x6   :  { %p3627_p3 = por %p3626_p2, %p3625_p1 }
   0x8   :  { %p3628_p4 = pnand %p3627_p3, %p3621_p0 }
   0xa   :  { %3631 = shalt.err (!%p3628_p4)
}
   0xb   :  { %s3657_s12 = smov 128   ;;  %s3658_s13 = smov 8  }
   0xc   :  { %22 = dma.hbm_to_vmem [thread:$0]  %s4266_s1, 2688, %s17_s10, [#allocation3], %s3657_s12, %s3657_s12, %s3658_s13  }
   0xd   :  { %3652 = dma.done.wait [#allocation3], 2688  }
   0xe   :  { %3653 = vsyncadd [#allocation3], 4294964608  ;;  %v3659_v0 = vmov 0.0   ;;  %vm3660_vm0 = vmmov 0   ;;  %v3693_v1 = vld [vmem:[#allocation2 + $0x28] sm:$0xff]  ;;  %v3695_v2 = vld [vmem:[#allocation2 + $0x20] sm:$0xff]  ;;  %v47_v18 = vlaneseq }
   0xf   :  { %3155 = vmatprep.subr.mxu0 %v3659_v0  ;;  %3166 = vmatprep.subr.mxu1 %v3659_v0  ;;  %v3697_v3 = vld [vmem:[#allocation2 + $0x8] sm:$0xff]  ;;  %v3701_v4 = vld [vmem:[#allocation2] sm:$0xff]  ;;  %vm127_vm1 = vcmask 130048   ;;  %v3710_v6 = vld [vmem:[#allocation2 + $0x18] sm:$0xff]  ;;  %s3661_s17 = smov 64   ;;  %s3662_s18 = smov 32  }
  0x10   :  { %3170 = vmatprep.mubr.msk.f32.mxu1 %vm3660_vm0, %v3659_v0  ;;  %3163 = vmatprep.mubr.msk.f32.mxu0 %vm3660_vm0, %v3659_v0  ;;  %v3706_v5 = vld [vmem:[%s4265_s0] sm:$0x3]  ;;  %v3717_v7 = vld [vmem:[#allocation2 + $0x10] sm:$0xff]  ;;  %v48_v19 = vand.u32 127, %v47_v18  ;;  %v3745_v31 = vld [vmem:[#allocation2 + $0x68] sm:$0xff]  ;;  %s3663_s19 = smov 112  }
  0x11   :  { %3156 = vmatpush3.msra.mxu0 %v3693_v1  ;;  %3167 = vmatpush3.msra.mxu1 %v3697_v3  ;;  %v3729_v10 = vld [vmem:[#allocation2 + $0x30] ss:$0 sm:$0xff]  ;;  %v3751_v33 = vld [vmem:[#allocation2 + $0x48] sm:$0xff]  ;;  %v3754_v34 = vld [vmem:[#allocation2 + $0x60] sm:$0xff]  ;;  %vm53_vm5 = vcmask 261120   ;;  %s3664_s20 = smov 96  }
  0x12   :  { %3157 = vmatprep.subr.mxu0 %v3659_v0  ;;  %3168 = vmatprep.subr.mxu1 %v3659_v0  ;;  %vm49_vm2 = vcmp.ge.s32.totalorder %v48_v19, 64  ;;  %vm50_vm3 = vcmp.lt.s32.totalorder %v48_v19, 96  ;;  %v3743_v30 = vld [vmem:[#allocation2 + $0x70] sm:$0xff]  ;;  %v3759_v35 = vld [vmem:[#allocation2 + $0x40] sm:$0xff]  ;;  %v3762_v36 = vld [vmem:[#allocation2 + $0x58] sm:$0xff]  ;;  %s3665_s21 = smov 80  }
  0x13   :  { %3158 = vmatpush3.msra.mxu0 %v3695_v2  ;;  %3169 = vmatpush3.msra.mxu1 %v3701_v4  ;;  %vm3732_vm4 = vmand %vm49_vm2, %vm50_vm3  ;;  %v3749_v32 = vld [vmem:[#allocation2 + $0x50] sm:$0xff]  ;;  %v3769_v37 = vld [vmem:[#allocation2 + $0x38] sm:$0xff]  ;;  %s3666_s22 = smov 48   ;;  %s3668_s25 = smov [#allocation5]   ;;  %vm2923_vm6 = vcmask 58368  }
  0x14   :  { %3159 = vmatprep.subr.mxu0 %v3659_v0  ;;  %3171 = vmatmul.mubr.msk.f32.vlgmr.msra.gmra.mxu1 %vm127_vm1, %v3706_v5  ;;  %v3818_v45 = vld [vmem:[#allocation2 + $0x78] ss:$0 sm:$0xff]  ;;  %v42_v22 = vld [vmem:[#allocation2 + $0x80] sm:$0xff]  ;;  %s2931_s26 = sshll.u32 %s3668_s25, 4  ;;  %s2932_s26 = int_to_ptr.vmem [resolvable:$true] %s2931_s26 }
  0x15   :  { %3160 = vmatpush3.msra.mxu0 %v3710_v6  ;;  %3173 = vmatprep.subr.mxu1 %v3659_v0  ;;  %s3632_s27 = scalar_lea.vmem %s2932_s26, 32  ;;  %p3637_p6 = scmp.lt.s32.totalorder %s2932_s26, %s2932_s26 }
  0x16   :  { %3161 = vmatprep.subr.mxu0 %v3659_v0  ;;  %3181 = vmatprep.mubr.msk.f32.mxu1 %vm3660_vm0, %v3659_v0  ;;  %p3633_p5 = scmp.ne.s32.totalorder %s2932_s26, %s3632_s27  ;;  %p3638_p7 = scmp.lt.s32.totalorder %s3632_s27, %s3632_s27 }
  0x17   :  { %3162 = vmatpush3.msra.mxu0 %v3717_v7  ;;  %3174 = vmatpush3.msra.mxu1 %v3743_v30 }
  0x18   :  { %3164 = vmatmul.mubr.f32.vlgmr.msra.gmra.mxu0 %v3659_v0  ;;  %3184 = vmatprep.subr.mxu0 %v3659_v0  ;;  %p3639_p8 = por %p3638_p7, %p3637_p6 }
  0x19   :  { %3192 = vmatprep.mubr.msk.f32.mxu0 %vm3660_vm0, %v3659_v0  ;;  %3175 = vmatprep.subr.mxu1 %v3659_v0 }
  0x1a   :  { %3185 = vmatpush3.msra.mxu0 %v3749_v32  ;;  %3176 = vmatpush3.msra.mxu1 %v3745_v31  ;;  %p3640_p9 = pnand %p3639_p8, %p3633_p5 }
  0x1b   :  { %3186 = vmatprep.subr.mxu0 %v3659_v0  ;;  %3177 = vmatprep.subr.mxu1 %v3659_v0 }
  0x1c   :  { %3187 = vmatpush3.msra.mxu0 %v3751_v33  ;;  %3178 = vmatpush3.msra.mxu1 %v3754_v34 }
  0x1d   :  { %3188 = vmatprep.subr.mxu0 %v3659_v0  ;;  %3179 = vmatprep.subr.mxu1 %v3659_v0 }
  0x1e   :  { %3189 = vmatpush3.msra.mxu0 %v3759_v35  ;;  %3180 = vmatpush3.msra.mxu1 %v3762_v36 }
  0x1f   :  { %3190 = vmatprep.subr.mxu0 %v3659_v0  ;;  %3182 = vmatmul.mubr.f32.vlgmr.msra.gmra.mxu1 %v3659_v0 }
  0x20   :  { %3195 = vmatprep.subr.mxu1 %v3659_v0  ;;  %3191 = vmatpush3.msra.mxu0 %v3769_v37 }
  0x21   :  { %3196 = vmatpush3.msra.mxu1 %v3693_v1  ;;  %3203 = vmatprep.mubr.msk.f32.mxu1 %vm3660_vm0, %v3659_v0 }
  0x22   :  { %3197 = vmatprep.subr.mxu1 %v3659_v0  ;;  %3213 = vmatprep.subr.mxu0 %v3659_v0 }
  0x23   :  { %3198 = vmatpush3.msra.mxu1 %v3695_v2 }
  0x24   :  { %3199 = vmatprep.subr.mxu1 %v3659_v0 }
  0x25   :  { %3200 = vmatpush3.msra.mxu1 %v3710_v6 }
  0x26   :  { %3201 = vmatprep.subr.mxu1 %v3659_v0 }
  0x27   :  { %3202 = vmatpush3.msra.mxu1 %v3717_v7 }
  0x28   :  { %3206 = vmatprep.subr.mxu1 %v3659_v0 }
  0xd4   :  { %v197_v8 = vpop.f32.mrf.mxu1 }
  0xd6   :  { %v3172_v9 = vpop.f32.mrf.mxu1 }
  0xd8   :  { %v123_v11 = vpop.f32.mrf.mxu0 }
  0xd9   :  { %v198_v12 = vadd.f32 %v197_v8, %v123_v11 }
  0xda   :  { %v3165_v13 = vpop.f32.mrf.mxu0 }
  0xdb   :  { %v205_v14 = vadd.f32 %v3729_v10, %v198_v12 }
  0xdd   :  { %v2942_v15 = vmul.f32 -1.442695, %v205_v14 }
  0xdf   :  { %3499 = vpow2.f32 %v2942_v15  ;;  %v298_v41 = vpop.f32.mrf.mxu1 }
  0xe1   :  { %v3183_v42 = vpop.f32.mrf.mxu1 }
  0xec   :  { %v3500_v16 = vpop.eup %3499 }
  0xed   :  { %v209_v17 = vadd.f32 1.0, %v3500_v16 }
  0xef   :  { %3501 = vrcp.f32 %v209_v17 }
  0xfc   :  { %v3502_v20 = vpop.eup %3501 }
  0xfd   :  { %v212_v21 = vmul.f32 2.0, %v3502_v20 }
  0xff   :  { %v2943_v23 = vadd.f32 -1.0, %v212_v21 }
 0x101   :  { %v214_v24 = vsel %vm3732_vm4, %v2943_v23, %v3502_v20 }
 0x102   :  { %217 = vrot.lane.b32.xlu0 %v214_v24, %s3661_s17  ;;  %v215_v27 = vmul.f32 0.0, %v214_v24 }
 0x174   :  { %v218_v25 = vpop.permute.xlu0 %217 }
 0x175   :  { %v220_v26 = vmul.f32 %v218_v25, %v214_v24 }
 0x177   :  { %222 = vrot.lane.b32.xlu0 %v220_v26, %s3662_s18 }
 0x17b   :  { %478 = vrot.lane.b32.xlu0 %v3706_v5, %s3663_s19 }
 0x1e9   :  { %v223_v28 = vpop.permute.xlu0 %222 }
 0x1ea   :  { %v3740_v29 = vadd.f32 %v223_v28, %v215_v27 }
 0x1ec   :  { %3503 = vtanh.f32 %v3740_v29 }
 0x1ed   :  { %v479_v44 = vpop.permute.xlu0 %478 }
 0x1f9   :  { %v3504_v38 = vpop.eup %3503 }
 0x1fa   :  { %228 = vrot.lane.b32.xlu1 %v3504_v38, %s3661_s17 }
 0x26c   :  { %v229_v39 = vpop.permute.xlu1 %228 }
 0x26d   :  { %v231_v40 = vmul.f32 %v229_v39, %v214_v24 }
 0x26f   :  { %303 = vrot.lane.b32.xlu1 %v231_v40, %s3662_s18 }
 0x2e1   :  { %v304_v43 = vpop.permute.xlu1 %303 }
 0x2e2   :  { %3193 = vmatmul.mubr.msk.f32.vlgmr.msra.gmra.mxu0 %vm53_vm5, %v304_v43  ;;  %3204 = vmatmul.mubr.msk.f32.vlgmr.msra.gmra.mxu1 %vm53_vm5, %v304_v43 }
 0x2e3   :  { %3207 = vmatpush3.msra.mxu1 %v3697_v3  ;;  %3210 = vmatprep.mubr.msk.f32.mxu1 %vm3660_vm0, %v3659_v0 }
 0x2e4   :  { %3208 = vmatprep.subr.mxu1 %v3659_v0  ;;  %3214 = vmatpush3.msra.mxu0 %v3743_v30 }
 0x2e5   :  { %3209 = vmatpush3.msra.mxu1 %v3701_v4  ;;  %3215 = vmatprep.subr.mxu0 %v3659_v0 }
 0x2e6   :  { %3211 = vmatmul.mubr.msk.f32.vlgmr.msra.gmra.mxu1 %vm127_vm1, %v479_v44  ;;  %3216 = vmatpush3.msra.mxu0 %v3745_v31 }
 0x2e7   :  { %3217 = vmatprep.subr.mxu0 %v3659_v0  ;;  %3224 = vmatprep.subr.mxu1 %v3659_v0 }
 0x2e8   :  { %3218 = vmatpush3.msra.mxu0 %v3754_v34  ;;  %3225 = vmatpush3.msra.mxu1 %v3749_v32 }
 0x2e9   :  { %3219 = vmatprep.subr.mxu0 %v3659_v0  ;;  %3226 = vmatprep.subr.mxu1 %v3659_v0 }
 0x2ea   :  { %3220 = vmatpush3.msra.mxu0 %v3762_v36  ;;  %3227 = vmatpush3.msra.mxu1 %v3751_v33 }
 0x2eb   :  { %3221 = vmatprep.mubr.msk.f32.mxu0 %vm3660_vm0, %v3659_v0  ;;  %3228 = vmatprep.subr.mxu1 %v3659_v0 }
 0x2ec   :  { %3235 = vmatprep.subr.mxu0 %v3659_v0  ;;  %3229 = vmatpush3.msra.mxu1 %v3759_v35 }
 0x2ed   :  { %3230 = vmatprep.subr.mxu1 %v3659_v0  ;;  %3232 = vmatprep.mubr.msk.f32.mxu1 %vm3660_vm0, %v3659_v0 }
 0x2ee   :  { %3231 = vmatpush3.msra.mxu1 %v3769_v37 }
 0x2ef   :  { %3246 = vmatprep.subr.mxu1 %v3659_v0 }
 0x3a2   :  { %v373_v46 = vpop.f32.mrf.mxu0  ;;  %v474_v47 = vpop.f32.mrf.mxu1 }
 0x3a3   :  { %v374_v48 = vadd.f32 %v373_v46, %v298_v41 }
 0x3a4   :  { %v3194_v49 = vpop.f32.mrf.mxu0  ;;  %v3205_v50 = vpop.f32.mrf.mxu1 }
 0x3a5   :  { %v381_v51 = vadd.f32 %v3818_v45, %v374_v48 }
 0x3a6   :  { %v548_v52 = vpop.f32.mrf.mxu1 }
 0x3a7   :  { %v2946_v53 = vmul.f32 -1.442695, %v381_v51  ;;  %v549_v54 = vadd.f32 %v548_v52, %v474_v47 }
 0x3a8   :  { %v3212_v55 = vpop.f32.mrf.mxu1 }
 0x3a9   :  { %3505 = vpow2.f32 %v2946_v53  ;;  %v552_v56 = vadd.f32 %v3729_v10, %v549_v54 }
 0x3ab   :  { %v2950_v57 = vmul.f32 -1.442695, %v552_v56 }
 0x3ad   :  { %3507 = vpow2.f32 %v2950_v57 }
 0x3b6   :  { %v3506_v58 = vpop.eup %3505 }
 0x3b7   :  { %v385_v59 = vadd.f32 1.0, %v3506_v58 }
 0x3b9   :  { %3509 = vrcp.f32 %v385_v59 }
 0x3ba   :  { %v3508_v60 = vpop.eup %3507 }
 0x3bb   :  { %v556_v61 = vadd.f32 1.0, %v3508_v60 }
 0x3bd   :  { %3511 = vrcp.f32 %v556_v61 }
 0x3c6   :  { %v3510_v62 = vpop.eup %3509 }
 0x3c7   :  { %v388_v63 = vmul.f32 2.0, %v3510_v62 }
 0x3c9   :  { %v2947_v8 = vadd.f32 -1.0, %v388_v63 }
 0x3ca   :  { %v3512_v9 = vpop.eup %3511 }
 0x3cb   :  { %v390_v11 = vsel %vm3732_vm4, %v2947_v8, %v3510_v62  ;;  %v559_v12 = vmul.f32 2.0, %v3512_v9 }
 0x3cc   :  { %393 = vrot.lane.b32.xlu1 %v390_v11, %s3661_s17  ;;  %v391_v19 = vmul.f32 0.0, %v390_v11 }
 0x3cd   :  { %v2951_v13 = vadd.f32 -1.0, %v559_v12 }
 0x3cf   :  { %v561_v14 = vsel %vm3732_vm4, %v2951_v13, %v3512_v9 }
 0x3d0   :  { %564 = vrot.lane.b32.xlu0 %v561_v14, %s3661_s17  ;;  %v562_v23 = vmul.f32 %v561_v14, %v3740_v29 }
 0x43e   :  { %v394_v15 = vpop.permute.xlu1 %393 }
 0x43f   :  { %v396_v16 = vmul.f32 %v394_v15, %v390_v11 }
 0x441   :  { %398 = vrot.lane.b32.xlu1 %v396_v16, %s3662_s18 }
 0x442   :  { %v565_v17 = vpop.permute.xlu0 %564 }
 0x443   :  { %v567_v18 = vmul.f32 %v565_v17, %v561_v14 }
 0x445   :  { %569 = vrot.lane.b32.xlu0 %v567_v18, %s3662_s18 }
 0x4b3   :  { %v399_v20 = vpop.permute.xlu1 %398 }
 0x4b4   :  { %v3830_v21 = vadd.f32 %v399_v20, %v391_v19 }
 0x4b6   :  { %3513 = vtanh.f32 %v3830_v21 }
 0x4b7   :  { %v570_v24 = vpop.permute.xlu0 %569 }
 0x4b8   :  { %v3834_v25 = vadd.f32 %v570_v24, %v562_v23 }
 0x4ba   :  { %3515 = vtanh.f32 %v3834_v25 }
 0x4c3   :  { %v3514_v26 = vpop.eup %3513 }
 0x4c4   :  { %404 = vrot.lane.b32.xlu1 %v3514_v26, %s3661_s17 }
 0x4c7   :  { %v3516_v27 = vpop.eup %3515 }
 0x4c8   :  { %575 = vrot.lane.b32.xlu0 %v3516_v27, %s3661_s17 }
 0x536   :  { %v405_v28 = vpop.permute.xlu1 %404 }
 0x537   :  { %v407_v38 = vmul.f32 %v405_v28, %v390_v11 }
 0x539   :  { %580 = vrot.lane.b32.xlu1 %v407_v38, %s3662_s18 }
 0x53a   :  { %v576_v39 = vpop.permute.xlu0 %575 }
 0x53b   :  { %v578_v40 = vmul.f32 %v576_v39, %v561_v14 }
 0x53d   :  { %655 = vrot.lane.b32.xlu0 %v578_v40, %s3662_s18  ;;  %826 = vrot.lane.b32.xlu1 %v3706_v5, %s3664_s20 }
 0x5ab   :  { %v581_v29 = vpop.permute.xlu1 %580 }
 0x5ac   :  { %3222 = vmatmul.mubr.msk.f32.vlgmr.msra.gmra.mxu0 %vm53_vm5, %v581_v29 }
 0x5ad   :  { %3236 = vmatpush3.msra.mxu0 %v3693_v1  ;;  %3243 = vmatprep.mubr.msk.f32.mxu0 %vm3660_vm0, %v3659_v0 }
 0x5ae   :  { %3237 = vmatprep.subr.mxu0 %v3659_v0 }
 0x5af   :  { %3238 = vmatpush3.msra.mxu0 %v3695_v2  ;;  %v656_v41 = vpop.permute.xlu0 %655  ;;  %v827_v42 = vpop.permute.xlu1 %826 }
 0x5b0   :  { %3239 = vmatprep.subr.mxu0 %v3659_v0  ;;  %3233 = vmatmul.mubr.msk.f32.vlgmr.msra.gmra.mxu1 %vm53_vm5, %v656_v41 }
 0x5b1   :  { %3240 = vmatpush3.msra.mxu0 %v3710_v6  ;;  %3247 = vmatpush3.msra.mxu1 %v3697_v3 }
 0x5b2   :  { %3241 = vmatprep.subr.mxu0 %v3659_v0  ;;  %3248 = vmatprep.subr.mxu1 %v3659_v0 }
 0x5b3   :  { %3242 = vmatpush3.msra.mxu0 %v3717_v7  ;;  %3249 = vmatpush3.msra.mxu1 %v3701_v4 }
 0x5b4   :  { %3244 = vmatmul.mubr.msk.f32.vlgmr.msra.gmra.mxu0 %vm53_vm5, %v656_v41  ;;  %3250 = vmatprep.mubr.msk.f32.mxu1 %vm3660_vm0, %v3659_v0 }
 0x5b5   :  { %3251 = vmatmul.mubr.msk.f32.vlgmr.msra.gmra.mxu1 %vm127_vm1, %v827_v42  ;;  %3253 = vmatprep.subr.mxu1 %v3659_v0 }
 0x5b6   :  { %3254 = vmatpush3.msra.mxu1 %v3743_v30  ;;  %3264 = vmatprep.subr.mxu0 %v3659_v0 }
 0x5b7   :  { %3255 = vmatprep.subr.mxu1 %v3659_v0  ;;  %3265 = vmatpush3.msra.mxu0 %v3749_v32 }
 0x5b8   :  { %3256 = vmatpush3.msra.mxu1 %v3745_v31  ;;  %3266 = vmatprep.subr.mxu0 %v3659_v0 }
 0x5b9   :  { %3257 = vmatprep.subr.mxu1 %v3659_v0  ;;  %3267 = vmatpush3.msra.mxu0 %v3751_v33 }
 0x5ba   :  { %3258 = vmatpush3.msra.mxu1 %v3754_v34  ;;  %3261 = vmatprep.mubr.msk.f32.mxu1 %vm3660_vm0, %v3659_v0 }
 0x5bb   :  { %3259 = vmatprep.subr.mxu1 %v3659_v0  ;;  %3268 = vmatprep.subr.mxu0 %v3659_v0 }
 0x5bc   :  { %3260 = vmatpush3.msra.mxu1 %v3762_v36  ;;  %3269 = vmatpush3.msra.mxu0 %v3759_v35 }
 0x5bd   :  { %3275 = vmatprep.subr.mxu1 %v3659_v0  ;;  %3270 = vmatprep.subr.mxu0 %v3659_v0 }
 0x5be   :  { %3271 = vmatpush3.msra.mxu0 %v3769_v37  ;;  %3272 = vmatprep.mubr.msk.f32.mxu0 %vm3660_vm0, %v3659_v0 }
 0x5bf   :  { %3286 = vmatprep.subr.mxu0 %v3659_v0 }
 0x66c   :  { %v650_v43 = vpop.f32.mrf.mxu0 }
 0x66e   :  { %v3223_v44 = vpop.f32.mrf.mxu0 }
 0x670   :  { %v725_v46 = vpop.f32.mrf.mxu1 }
 0x671   :  { %v726_v47 = vadd.f32 %v725_v46, %v650_v43 }
 0x672   :  { %v3234_v48 = vpop.f32.mrf.mxu1 }
 0x673   :  { %v729_v49 = vadd.f32 %v3818_v45, %v726_v47 }
 0x674   :  { %v822_v50 = vpop.f32.mrf.mxu0 }
 0x675   :  { %v2954_v51 = vmul.f32 -1.442695, %v729_v49  ;;  %v896_v52 = vpop.f32.mrf.mxu1 }
 0x676   :  { %v897_v53 = vadd.f32 %v896_v52, %v822_v50  ;;  %v3245_v54 = vpop.f32.mrf.mxu0 }
 0x677   :  { %3517 = vpow2.f32 %v2954_v51  ;;  %v3252_v55 = vpop.f32.mrf.mxu1 }
 0x678   :  { %v900_v56 = vadd.f32 %v3729_v10, %v897_v53 }
 0x67a   :  { %v2958_v57 = vmul.f32 -1.442695, %v900_v56 }
 0x67c   :  { %3519 = vpow2.f32 %v2958_v57 }
 0x684   :  { %v3518_v58 = vpop.eup %3517 }
 0x685   :  { %v733_v59 = vadd.f32 1.0, %v3518_v58 }
 0x687   :  { %3521 = vrcp.f32 %v733_v59 }
 0x689   :  { %v3520_v60 = vpop.eup %3519 }
 0x68a   :  { %v904_v61 = vadd.f32 1.0, %v3520_v60 }
 0x68c   :  { %3523 = vrcp.f32 %v904_v61 }
 0x694   :  { %v3522_v62 = vpop.eup %3521 }
 0x695   :  { %v736_v63 = vmul.f32 2.0, %v3522_v62 }
 0x697   :  { %v2955_v8 = vadd.f32 -1.0, %v736_v63 }
 0x699   :  { %v3524_v9 = vpop.eup %3523  ;;  %v738_v11 = vsel %vm3732_vm4, %v2955_v8, %v3522_v62 }
 0x69a   :  { %741 = vrot.lane.b32.xlu0 %v738_v11, %s3661_s17  ;;  %v907_v12 = vmul.f32 2.0, %v3524_v9  ;;  %v739_v19 = vmul.f32 %v738_v11, %v3830_v21 }
 0x69c   :  { %v2959_v13 = vadd.f32 -1.0, %v907_v12 }
 0x69e   :  { %v909_v14 = vsel %vm3732_vm4, %v2959_v13, %v3524_v9 }
 0x69f   :  { %912 = vrot.lane.b32.xlu1 %v909_v14, %s3661_s17  ;;  %v910_v24 = vmul.f32 %v909_v14, %v3834_v25 }
 0x70c   :  { %v742_v15 = vpop.permute.xlu0 %741 }
 0x70d   :  { %v744_v16 = vmul.f32 %v742_v15, %v738_v11 }
 0x70f   :  { %746 = vrot.lane.b32.xlu0 %v744_v16, %s3662_s18 }
 0x711   :  { %v913_v17 = vpop.permute.xlu1 %912 }
 0x712   :  { %v915_v18 = vmul.f32 %v913_v17, %v909_v14 }
 0x714   :  { %917 = vrot.lane.b32.xlu1 %v915_v18, %s3662_s18 }
 0x781   :  { %v747_v20 = vpop.permute.xlu0 %746 }
 0x782   :  { %v3893_v23 = vadd.f32 %v747_v20, %v739_v19 }
 0x784   :  { %3525 = vtanh.f32 %v3893_v23 }
 0x786   :  { %v918_v26 = vpop.permute.xlu1 %917 }
 0x787   :  { %v3897_v27 = vadd.f32 %v918_v26, %v910_v24 }
 0x789   :  { %3527 = vtanh.f32 %v3897_v27 }
 0x791   :  { %v3526_v28 = vpop.eup %3525 }
 0x792   :  { %752 = vrot.lane.b32.xlu0 %v3526_v28, %s3661_s17 }
 0x796   :  { %v3528_v38 = vpop.eup %3527 }
 0x797   :  { %923 = vrot.lane.b32.xlu1 %v3528_v38, %s3661_s17 }
 0x804   :  { %v753_v39 = vpop.permute.xlu0 %752 }
 0x805   :  { %v755_v21 = vmul.f32 %v753_v39, %v738_v11 }
 0x807   :  { %928 = vrot.lane.b32.xlu0 %v755_v21, %s3662_s18 }
 0x809   :  { %v924_v40 = vpop.permute.xlu1 %923 }
 0x80a   :  { %v926_v29 = vmul.f32 %v924_v40, %v909_v14 }
 0x80b   :  { %1174 = vrot.lane.b32.xlu0 %v3706_v5, %s3665_s21 }
 0x80c   :  { %1003 = vrot.lane.b32.xlu1 %v926_v29, %s3662_s18 }
 0x879   :  { %v929_v25 = vpop.permute.xlu0 %928 }
 0x87a   :  { %3262 = vmatmul.mubr.msk.f32.vlgmr.msra.gmra.mxu1 %vm53_vm5, %v929_v25 }
 0x87b   :  { %3276 = vmatpush3.msra.mxu1 %v3693_v1  ;;  %3283 = vmatprep.mubr.msk.f32.mxu1 %vm3660_vm0, %v3659_v0 }
 0x87c   :  { %3277 = vmatprep.subr.mxu1 %v3659_v0 }
 0x87d   :  { %3278 = vmatpush3.msra.mxu1 %v3695_v2  ;;  %v1175_v42 = vpop.permute.xlu0 %1174 }
 0x87e   :  { %3279 = vmatprep.subr.mxu1 %v3659_v0  ;;  %v1004_v41 = vpop.permute.xlu1 %1003 }
 0x87f   :  { %3273 = vmatmul.mubr.msk.f32.vlgmr.msra.gmra.mxu0 %vm53_vm5, %v1004_v41  ;;  %3280 = vmatpush3.msra.mxu1 %v3710_v6 }
 0x880   :  { %3287 = vmatpush3.msra.mxu0 %v3697_v3  ;;  %3281 = vmatprep.subr.mxu1 %v3659_v0 }
 0x881   :  { %3288 = vmatprep.subr.mxu0 %v3659_v0  ;;  %3282 = vmatpush3.msra.mxu1 %v3717_v7 }
 0x882   :  { %3289 = vmatpush3.msra.mxu0 %v3701_v4  ;;  %3284 = vmatmul.mubr.msk.f32.vlgmr.msra.gmra.mxu1 %vm53_vm5, %v1004_v41 }
 0x883   :  { %3290 = vmatprep.mubr.msk.f32.mxu0 %vm3660_vm0, %v3659_v0  ;;  %3293 = vmatprep.subr.mxu0 %v3659_v0 }
 0x884   :  { %3291 = vmatmul.mubr.msk.f32.vlgmr.msra.gmra.mxu0 %vm127_vm1, %v1175_v42  ;;  %3304 = vmatprep.subr.mxu1 %v3659_v0 }
 0x885   :  { %3294 = vmatpush3.msra.mxu0 %v3743_v30  ;;  %3305 = vmatpush3.msra.mxu1 %v3749_v32 }
 0x886   :  { %3295 = vmatprep.subr.mxu0 %v3659_v0  ;;  %3306 = vmatprep.subr.mxu1 %v3659_v0 }
 0x887   :  { %3296 = vmatpush3.msra.mxu0 %v3745_v31  ;;  %3307 = vmatpush3.msra.mxu1 %v3751_v33 }
 0x888   :  { %3297 = vmatprep.subr.mxu0 %v3659_v0  ;;  %3301 = vmatprep.mubr.msk.f32.mxu0 %vm3660_vm0, %v3659_v0 }
 0x889   :  { %3298 = vmatpush3.msra.mxu0 %v3754_v34  ;;  %3308 = vmatprep.subr.mxu1 %v3659_v0 }
 0x88a   :  { %3299 = vmatprep.subr.mxu0 %v3659_v0  ;;  %3309 = vmatpush3.msra.mxu1 %v3759_v35 }
 0x88b   :  { %3300 = vmatpush3.msra.mxu0 %v3762_v36  ;;  %3310 = vmatprep.subr.mxu1 %v3659_v0 }
 0x88c   :  { %3315 = vmatprep.subr.mxu0 %v3659_v0  ;;  %3311 = vmatpush3.msra.mxu1 %v3769_v37 }
 0x88d   :  { %3312 = vmatprep.mubr.msk.f32.mxu1 %vm3660_vm0, %v3659_v0  ;;  %3326 = vmatprep.subr.mxu1 %v3659_v0 }
 0x93a   :  { %v998_v43 = vpop.f32.mrf.mxu1 }
 0x93c   :  { %v3263_v44 = vpop.f32.mrf.mxu1 }
 0x93f   :  { %v1073_v46 = vpop.f32.mrf.mxu0 }
 0x940   :  { %v1074_v47 = vadd.f32 %v1073_v46, %v998_v43 }
 0x941   :  { %v3274_v48 = vpop.f32.mrf.mxu0 }
 0x942   :  { %v1077_v49 = vadd.f32 %v3818_v45, %v1074_v47  ;;  %v1170_v50 = vpop.f32.mrf.mxu1 }
 0x944   :  { %v2962_v51 = vmul.f32 -1.442695, %v1077_v49  ;;  %v1244_v52 = vpop.f32.mrf.mxu0  ;;  %v3285_v53 = vpop.f32.mrf.mxu1 }
 0x945   :  { %v1245_v54 = vadd.f32 %v1244_v52, %v1170_v50 }
 0x946   :  { %3529 = vpow2.f32 %v2962_v51  ;;  %v3292_v55 = vpop.f32.mrf.mxu0 }
 0x947   :  { %v1248_v56 = vadd.f32 %v3729_v10, %v1245_v54 }
 0x949   :  { %v2966_v57 = vmul.f32 -1.442695, %v1248_v56 }
 0x94b   :  { %3531 = vpow2.f32 %v2966_v57 }
 0x953   :  { %v3530_v58 = vpop.eup %3529 }
 0x954   :  { %v1081_v59 = vadd.f32 1.0, %v3530_v58 }
 0x956   :  { %3533 = vrcp.f32 %v1081_v59 }
 0x958   :  { %v3532_v60 = vpop.eup %3531 }
 0x959   :  { %v1252_v61 = vadd.f32 1.0, %v3532_v60 }
 0x95b   :  { %3535 = vrcp.f32 %v1252_v61 }
 0x963   :  { %v3534_v62 = vpop.eup %3533 }
 0x964   :  { %v1084_v63 = vmul.f32 2.0, %v3534_v62 }
 0x966   :  { %v2963_v8 = vadd.f32 -1.0, %v1084_v63 }
 0x968   :  { %v3536_v9 = vpop.eup %3535  ;;  %v1086_v11 = vsel %vm3732_vm4, %v2963_v8, %v3534_v62 }
 0x969   :  { %1089 = vrot.lane.b32.xlu1 %v1086_v11, %s3661_s17  ;;  %v1255_v12 = vmul.f32 2.0, %v3536_v9  ;;  %v1087_v19 = vmul.f32 %v1086_v11, %v3893_v23 }
 0x96b   :  { %v2967_v13 = vadd.f32 -1.0, %v1255_v12 }
 0x96d   :  { %v1257_v14 = vsel %vm3732_vm4, %v2967_v13, %v3536_v9 }
 0x96e   :  { %1260 = vrot.lane.b32.xlu0 %v1257_v14, %s3661_s17  ;;  %v1258_v26 = vmul.f32 %v1257_v14, %v3897_v27 }
 0x9db   :  { %v1090_v15 = vpop.permute.xlu1 %1089 }
 0x9dc   :  { %v1092_v16 = vmul.f32 %v1090_v15, %v1086_v11 }
 0x9de   :  { %1094 = vrot.lane.b32.xlu1 %v1092_v16, %s3662_s18 }
 0x9e0   :  { %v1261_v17 = vpop.permute.xlu0 %1260 }
 0x9e1   :  { %v1263_v18 = vmul.f32 %v1261_v17, %v1257_v14 }
 0x9e3   :  { %1265 = vrot.lane.b32.xlu0 %v1263_v18, %s3662_s18 }
 0xa50   :  { %v1095_v20 = vpop.permute.xlu1 %1094 }
 0xa51   :  { %v3956_v24 = vadd.f32 %v1095_v20, %v1087_v19 }
 0xa53   :  { %3537 = vtanh.f32 %v3956_v24 }
 0xa55   :  { %v1266_v28 = vpop.permute.xlu0 %1265 }
 0xa56   :  { %v3960_v38 = vadd.f32 %v1266_v28, %v1258_v26 }
 0xa58   :  { %3539 = vtanh.f32 %v3960_v38 }
 0xa60   :  { %v3538_v39 = vpop.eup %3537 }
 0xa61   :  { %1100 = vrot.lane.b32.xlu1 %v3538_v39, %s3661_s17 }
 0xa65   :  { %v3540_v21 = vpop.eup %3539 }
 0xa66   :  { %1271 = vrot.lane.b32.xlu0 %v3540_v21, %s3661_s17 }
 0xad3   :  { %v1101_v40 = vpop.permute.xlu1 %1100 }
 0xad4   :  { %v1103_v23 = vmul.f32 %v1101_v40, %v1086_v11 }
 0xad6   :  { %1276 = vrot.lane.b32.xlu1 %v1103_v23, %s3662_s18 }
 0xad8   :  { %v1272_v29 = vpop.permute.xlu0 %1271 }
 0xad9   :  { %v1274_v25 = vmul.f32 %v1272_v29, %v1257_v14 }
 0xada   :  { %1522 = vrot.lane.b32.xlu1 %v3706_v5, %s3661_s17 }
 0xadb   :  { %1351 = vrot.lane.b32.xlu0 %v1274_v25, %s3662_s18 }
 0xb48   :  { %v1277_v27 = vpop.permute.xlu1 %1276 }
 0xb49   :  { %3302 = vmatmul.mubr.msk.f32.vlgmr.msra.gmra.mxu0 %vm53_vm5, %v1277_v27 }
 0xb4a   :  { %3316 = vmatpush3.msra.mxu0 %v3693_v1  ;;  %3323 = vmatprep.mubr.msk.f32.mxu0 %vm3660_vm0, %v3659_v0 }
 0xb4b   :  { %3317 = vmatprep.subr.mxu0 %v3659_v0 }
 0xb4c   :  { %3318 = vmatpush3.msra.mxu0 %v3695_v2  ;;  %v1523_v42 = vpop.permute.xlu1 %1522 }
 0xb4d   :  { %3319 = vmatprep.subr.mxu0 %v3659_v0  ;;  %v1352_v41 = vpop.permute.xlu0 %1351 }
 0xb4e   :  { %3313 = vmatmul.mubr.msk.f32.vlgmr.msra.gmra.mxu1 %vm53_vm5, %v1352_v41  ;;  %3320 = vmatpush3.msra.mxu0 %v3710_v6 }
 0xb4f   :  { %3327 = vmatpush3.msra.mxu1 %v3697_v3  ;;  %3321 = vmatprep.subr.mxu0 %v3659_v0 }
 0xb50   :  { %3328 = vmatprep.subr.mxu1 %v3659_v0  ;;  %3322 = vmatpush3.msra.mxu0 %v3717_v7 }
 0xb51   :  { %3329 = vmatpush3.msra.mxu1 %v3701_v4  ;;  %3324 = vmatmul.mubr.msk.f32.vlgmr.msra.gmra.mxu0 %vm53_vm5, %v1352_v41 }
 0xb52   :  { %3330 = vmatprep.mubr.msk.f32.mxu1 %vm3660_vm0, %v3659_v0  ;;  %3333 = vmatprep.subr.mxu1 %v3659_v0 }
 0xb53   :  { %3331 = vmatmul.mubr.msk.f32.vlgmr.msra.gmra.mxu1 %vm127_vm1, %v1523_v42  ;;  %3344 = vmatprep.subr.mxu0 %v3659_v0 }
 0xb54   :  { %3334 = vmatpush3.msra.mxu1 %v3743_v30  ;;  %3345 = vmatpush3.msra.mxu0 %v3749_v32 }
 0xb55   :  { %3335 = vmatprep.subr.mxu1 %v3659_v0  ;;  %3346 = vmatprep.subr.mxu0 %v3659_v0 }
 0xb56   :  { %3336 = vmatpush3.msra.mxu1 %v3745_v31  ;;  %3347 = vmatpush3.msra.mxu0 %v3751_v33 }
 0xb57   :  { %3337 = vmatprep.subr.mxu1 %v3659_v0  ;;  %3341 = vmatprep.mubr.msk.f32.mxu1 %vm3660_vm0, %v3659_v0 }
 0xb58   :  { %3338 = vmatpush3.msra.mxu1 %v3754_v34  ;;  %3348 = vmatprep.subr.mxu0 %v3659_v0 }
 0xb59   :  { %3339 = vmatprep.subr.mxu1 %v3659_v0  ;;  %3349 = vmatpush3.msra.mxu0 %v3759_v35 }
 0xb5a   :  { %3340 = vmatpush3.msra.mxu1 %v3762_v36  ;;  %3350 = vmatprep.subr.mxu0 %v3659_v0 }
 0xb5b   :  { %3355 = vmatprep.subr.mxu1 %v3659_v0  ;;  %3351 = vmatpush3.msra.mxu0 %v3769_v37 }
 0xb5c   :  { %3352 = vmatprep.mubr.msk.f32.mxu0 %vm3660_vm0, %v3659_v0  ;;  %3366 = vmatprep.subr.mxu0 %v3659_v0 }
 0xc09   :  { %v1346_v43 = vpop.f32.mrf.mxu0 }
 0xc0b   :  { %v3303_v44 = vpop.f32.mrf.mxu0 }
 0xc0e   :  { %v1421_v46 = vpop.f32.mrf.mxu1 }
 0xc0f   :  { %v1422_v47 = vadd.f32 %v1421_v46, %v1346_v43 }
 0xc10   :  { %v3314_v48 = vpop.f32.mrf.mxu1 }
 0xc11   :  { %v1425_v49 = vadd.f32 %v3818_v45, %v1422_v47  ;;  %v1518_v50 = vpop.f32.mrf.mxu0 }
 0xc13   :  { %v2970_v51 = vmul.f32 -1.442695, %v1425_v49  ;;  %v1592_v52 = vpop.f32.mrf.mxu1  ;;  %v3325_v53 = vpop.f32.mrf.mxu0 }
 0xc14   :  { %v1593_v54 = vadd.f32 %v1592_v52, %v1518_v50 }
 0xc15   :  { %3541 = vpow2.f32 %v2970_v51  ;;  %v3332_v55 = vpop.f32.mrf.mxu1 }
 0xc16   :  { %v1596_v56 = vadd.f32 %v3729_v10, %v1593_v54 }
 0xc18   :  { %v2974_v57 = vmul.f32 -1.442695, %v1596_v56 }
 0xc1a   :  { %3543 = vpow2.f32 %v2974_v57 }
 0xc22   :  { %v3542_v58 = vpop.eup %3541 }
 0xc23   :  { %v1429_v59 = vadd.f32 1.0, %v3542_v58 }
 0xc25   :  { %3545 = vrcp.f32 %v1429_v59 }
 0xc27   :  { %v3544_v60 = vpop.eup %3543 }
 0xc28   :  { %v1600_v61 = vadd.f32 1.0, %v3544_v60 }
 0xc2a   :  { %3547 = vrcp.f32 %v1600_v61 }
 0xc32   :  { %v3546_v62 = vpop.eup %3545 }
 0xc33   :  { %v1432_v63 = vmul.f32 2.0, %v3546_v62 }
 0xc35   :  { %v2971_v8 = vadd.f32 -1.0, %v1432_v63 }
 0xc37   :  { %v3548_v9 = vpop.eup %3547  ;;  %v1434_v11 = vsel %vm3732_vm4, %v2971_v8, %v3546_v62 }
 0xc38   :  { %1437 = vrot.lane.b32.xlu0 %v1434_v11, %s3661_s17  ;;  %v1603_v12 = vmul.f32 2.0, %v3548_v9  ;;  %v1435_v19 = vmul.f32 %v1434_v11, %v3956_v24 }
 0xc3a   :  { %v2975_v13 = vadd.f32 -1.0, %v1603_v12 }
 0xc3c   :  { %v1605_v14 = vsel %vm3732_vm4, %v2975_v13, %v3548_v9 }
 0xc3d   :  { %1608 = vrot.lane.b32.xlu1 %v1605_v14, %s3661_s17  ;;  %v1606_v28 = vmul.f32 %v1605_v14, %v3960_v38 }
 0xcaa   :  { %v1438_v15 = vpop.permute.xlu0 %1437 }
 0xcab   :  { %v1440_v16 = vmul.f32 %v1438_v15, %v1434_v11  ;;  %v4096_v15 = vld [vmem:[%s4265_s0] sm:$0x3]  ;;  %s3667_s0 = smov 16  }
 0xcad   :  { %1442 = vrot.lane.b32.xlu0 %v1440_v16, %s3662_s18 }
 0xcaf   :  { %v1609_v17 = vpop.permute.xlu1 %1608 }
 0xcb0   :  { %v1611_v18 = vmul.f32 %v1609_v17, %v1605_v14  ;;  %v4102_v17 = vld [vmem:[#allocation2 + $0x28] sm:$0xff] }
 0xcb2   :  { %1613 = vrot.lane.b32.xlu1 %v1611_v18, %s3662_s18  ;;  %v4108_v18 = vld [vmem:[#allocation2 + $0x20] sm:$0xff] }
 0xd1f   :  { %v1443_v20 = vpop.permute.xlu0 %1442 }
 0xd20   :  { %v4020_v26 = vadd.f32 %v1443_v20, %v1435_v19  ;;  %v4113_v20 = vld [vmem:[#allocation2 + $0x18] sm:$0xff] }
 0xd22   :  { %3549 = vtanh.f32 %v4020_v26 }
 0xd24   :  { %v1614_v39 = vpop.permute.xlu1 %1613 }
 0xd25   :  { %v4024_v21 = vadd.f32 %v1614_v39, %v1606_v28  ;;  %v4121_v28 = vld [vmem:[#allocation2 + $0x10] sm:$0xff] }
 0xd27   :  { %3551 = vtanh.f32 %v4024_v21 }
 0xd2f   :  { %v3550_v40 = vpop.eup %3549 }
 0xd30   :  { %1448 = vrot.lane.b32.xlu0 %v3550_v40, %s3661_s17  ;;  %v4133_v40 = vld [vmem:[#allocation2 + $0x70] sm:$0xff] }
 0xd34   :  { %v3552_v23 = vpop.eup %3551 }
 0xd35   :  { %1619 = vrot.lane.b32.xlu1 %v3552_v23, %s3661_s17  ;;  %v4136_v23 = vld [vmem:[#allocation2 + $0x50] sm:$0xff] }
 0xda2   :  { %v1449_v29 = vpop.permute.xlu0 %1448 }
 0xda3   :  { %v1451_v24 = vmul.f32 %v1449_v29, %v1434_v11  ;;  %v4141_v29 = vld [vmem:[#allocation2 + $0x68] sm:$0xff] }
 0xda5   :  { %1624 = vrot.lane.b32.xlu0 %v1451_v24, %s3662_s18  ;;  %v4144_v24 = vld [vmem:[#allocation2 + $0x48] sm:$0xff] }
 0xda7   :  { %v1620_v25 = vpop.permute.xlu1 %1619 }
 0xda8   :  { %v1622_v27 = vmul.f32 %v1620_v25, %v1605_v14  ;;  %v4150_v25 = vld [vmem:[#allocation2 + $0x60] sm:$0xff] }
 0xda9   :  { %1870 = vrot.lane.b32.xlu0 %v3706_v5, %s3666_s22 }
 0xdaa   :  { %1699 = vrot.lane.b32.xlu1 %v1622_v27, %s3662_s18  ;;  %v4155_v27 = vld [vmem:[#allocation2 + $0x40] sm:$0xff] }
 0xe17   :  { %v1625_v38 = vpop.permute.xlu0 %1624 }
 0xe18   :  { %3342 = vmatmul.mubr.msk.f32.vlgmr.msra.gmra.mxu1 %vm53_vm5, %v1625_v38  ;;  %v4158_v38 = vld [vmem:[#allocation2 + $0x58] sm:$0xff] }
 0xe19   :  { %3356 = vmatpush3.msra.mxu1 %v3693_v1  ;;  %3363 = vmatprep.mubr.msk.f32.mxu1 %vm3660_vm0, %v3659_v0 }
 0xe1a   :  { %3357 = vmatprep.subr.mxu1 %v3659_v0 }
 0xe1b   :  { %3358 = vmatpush3.msra.mxu1 %v3695_v2  ;;  %v1871_v1 = vpop.permute.xlu0 %1870 }
 0xe1c   :  { %3359 = vmatprep.subr.mxu1 %v3659_v0  ;;  %v1700_v41 = vpop.permute.xlu1 %1699 }
 0xe1d   :  { %3353 = vmatmul.mubr.msk.f32.vlgmr.msra.gmra.mxu0 %vm53_vm5, %v1700_v41  ;;  %3360 = vmatpush3.msra.mxu1 %v3710_v6 }
 0xe1e   :  { %3367 = vmatpush3.msra.mxu0 %v3697_v3  ;;  %3361 = vmatprep.subr.mxu1 %v3659_v0 }
 0xe1f   :  { %3368 = vmatprep.subr.mxu0 %v3659_v0  ;;  %3362 = vmatpush3.msra.mxu1 %v3717_v7 }
 0xe20   :  { %3369 = vmatpush3.msra.mxu0 %v3701_v4  ;;  %3364 = vmatmul.mubr.msk.f32.vlgmr.msra.gmra.mxu1 %vm53_vm5, %v1700_v41  ;;  %v4163_v41 = vld [vmem:[#allocation2 + $0x38] sm:$0xff] }
 0xe21   :  { %3370 = vmatprep.mubr.msk.f32.mxu0 %vm3660_vm0, %v3659_v0  ;;  %3373 = vmatprep.subr.mxu0 %v3659_v0 }
 0xe22   :  { %3371 = vmatmul.mubr.msk.f32.vlgmr.msra.gmra.mxu0 %vm127_vm1, %v1871_v1  ;;  %3384 = vmatprep.subr.mxu1 %v3659_v0 }
 0xe23   :  { %3374 = vmatpush3.msra.mxu0 %v3743_v30  ;;  %3385 = vmatpush3.msra.mxu1 %v3749_v32 }
 0xe24   :  { %3375 = vmatprep.subr.mxu0 %v3659_v0  ;;  %3386 = vmatprep.subr.mxu1 %v3659_v0 }
 0xe25   :  { %3376 = vmatpush3.msra.mxu0 %v3745_v31  ;;  %3387 = vmatpush3.msra.mxu1 %v3751_v33 }
 0xe26   :  { %3377 = vmatprep.subr.mxu0 %v3659_v0  ;;  %3381 = vmatprep.mubr.msk.f32.mxu0 %vm3660_vm0, %v3659_v0 }
 0xe27   :  { %3378 = vmatpush3.msra.mxu0 %v3754_v34  ;;  %3388 = vmatprep.subr.mxu1 %v3659_v0 }
 0xe28   :  { %3379 = vmatprep.subr.mxu0 %v3659_v0  ;;  %3389 = vmatpush3.msra.mxu1 %v3759_v35 }
 0xe29   :  { %3380 = vmatpush3.msra.mxu0 %v3762_v36  ;;  %3390 = vmatprep.subr.mxu1 %v3659_v0 }
 0xe2a   :  { %3395 = vmatprep.subr.mxu0 %v3659_v0  ;;  %3391 = vmatpush3.msra.mxu1 %v3769_v37 }
 0xe2b   :  { %3392 = vmatprep.mubr.msk.f32.mxu1 %vm3660_vm0, %v3659_v0  ;;  %3406 = vmatprep.subr.mxu1 %v3659_v0 }
 0xed8   :  { %v1694_v2 = vpop.f32.mrf.mxu1 }
 0xeda   :  { %v3343_v3 = vpop.f32.mrf.mxu1 }
 0xedd   :  { %v1769_v4 = vpop.f32.mrf.mxu0 }
 0xede   :  { %v1770_v5 = vadd.f32 %v1769_v4, %v1694_v2 }
 0xedf   :  { %v3354_v6 = vpop.f32.mrf.mxu0 }
 0xee0   :  { %v1773_v7 = vadd.f32 %v3818_v45, %v1770_v5  ;;  %v1866_v30 = vpop.f32.mrf.mxu1 }
 0xee2   :  { %v2978_v31 = vmul.f32 -1.442695, %v1773_v7  ;;  %v1940_v32 = vpop.f32.mrf.mxu0  ;;  %v3365_v33 = vpop.f32.mrf.mxu1 }
 0xee3   :  { %v1941_v34 = vadd.f32 %v1940_v32, %v1866_v30 }
 0xee4   :  { %3553 = vpow2.f32 %v2978_v31  ;;  %v3372_v35 = vpop.f32.mrf.mxu0 }
 0xee5   :  { %v1944_v36 = vadd.f32 %v3729_v10, %v1941_v34  ;;  %v4170_v35 = vld [vmem:[#allocation2 + $0x30] ss:$0 sm:$0xff] }
 0xee7   :  { %v2982_v37 = vmul.f32 -1.442695, %v1944_v36 }
 0xee9   :  { %3555 = vpow2.f32 %v2982_v37 }
 0xef1   :  { %v3554_v42 = vpop.eup %3553 }
 0xef2   :  { %v1777_v43 = vadd.f32 1.0, %v3554_v42 }
 0xef4   :  { %3557 = vrcp.f32 %v1777_v43 }
 0xef6   :  { %v3556_v44 = vpop.eup %3555 }
 0xef7   :  { %v1948_v46 = vadd.f32 1.0, %v3556_v44 }
 0xef9   :  { %3559 = vrcp.f32 %v1948_v46 }
 0xf01   :  { %v3558_v47 = vpop.eup %3557 }
 0xf02   :  { %v1780_v48 = vmul.f32 2.0, %v3558_v47 }
 0xf04   :  { %v2979_v49 = vadd.f32 -1.0, %v1780_v48 }
 0xf06   :  { %v3560_v50 = vpop.eup %3559  ;;  %v1782_v51 = vsel %vm3732_vm4, %v2979_v49, %v3558_v47 }
 0xf07   :  { %1785 = vrot.lane.b32.xlu1 %v1782_v51, %s3661_s17  ;;  %v1951_v52 = vmul.f32 2.0, %v3560_v50  ;;  %v1783_v58 = vmul.f32 %v1782_v51, %v4020_v26  ;;  %v4116_v26 = vld [vmem:[#allocation2 + $0x8] sm:$0xff] }
 0xf09   :  { %v2983_v53 = vadd.f32 -1.0, %v1951_v52 }
 0xf0b   :  { %v1953_v10 = vsel %vm3732_vm4, %v2983_v53, %v3560_v50 }
 0xf0c   :  { %1956 = vrot.lane.b32.xlu0 %v1953_v10, %s3661_s17  ;;  %v1954_v61 = vmul.f32 %v1953_v10, %v4024_v21  ;;  %v4124_v21 = vld [vmem:[#allocation2] sm:$0xff] }
 0xf79   :  { %v1786_v54 = vpop.permute.xlu1 %1785 }
 0xf7a   :  { %v1788_v55 = vmul.f32 %v1786_v54, %v1782_v51 }
 0xf7c   :  { %1790 = vrot.lane.b32.xlu1 %v1788_v55, %s3662_s18 }
 0xf7e   :  { %v1957_v56 = vpop.permute.xlu0 %1956 }
 0xf7f   :  { %v1959_v57 = vmul.f32 %v1957_v56, %v1953_v10 }
 0xf81   :  { %1961 = vrot.lane.b32.xlu0 %v1959_v57, %s3662_s18 }
 0xfee   :  { %v1791_v59 = vpop.permute.xlu1 %1790 }
 0xfef   :  { %v4083_v60 = vadd.f32 %v1791_v59, %v1783_v58 }
 0xff1   :  { %3561 = vtanh.f32 %v4083_v60 }
 0xff3   :  { %v1962_v62 = vpop.permute.xlu0 %1961 }
 0xff4   :  { %v4087_v63 = vadd.f32 %v1962_v62, %v1954_v61 }
 0xff6   :  { %3563 = vtanh.f32 %v4087_v63 }
 0xffe   :  { %v3562_v8 = vpop.eup %3561 }
 0xfff   :  { %1796 = vrot.lane.b32.xlu1 %v3562_v8, %s3661_s17 }
0x1003   :  { %v3564_v9 = vpop.eup %3563 }
0x1004   :  { %1967 = vrot.lane.b32.xlu0 %v3564_v9, %s3661_s17 }
0x1071   :  { %v1797_v11 = vpop.permute.xlu1 %1796 }
0x1072   :  { %v1799_v12 = vmul.f32 %v1797_v11, %v1782_v51 }
0x1074   :  { %1972 = vrot.lane.b32.xlu1 %v1799_v12, %s3662_s18 }
0x1076   :  { %v1968_v13 = vpop.permute.xlu0 %1967 }
0x1077   :  { %v1970_v14 = vmul.f32 %v1968_v13, %v1953_v10 }
0x1078   :  { %2218 = vrot.lane.b32.xlu1 %v4096_v15, %s3662_s18 }
0x1079   :  { %2047 = vrot.lane.b32.xlu0 %v1970_v14, %s3662_s18 }
0x10e6   :  { %v1973_v16 = vpop.permute.xlu1 %1972 }
0x10e7   :  { %3382 = vmatmul.mubr.msk.f32.vlgmr.msra.gmra.mxu0 %vm53_vm5, %v1973_v16 }
0x10e8   :  { %3396 = vmatpush3.msra.mxu0 %v4102_v17  ;;  %3403 = vmatprep.mubr.msk.f32.mxu0 %vm3660_vm0, %v3659_v0 }
0x10e9   :  { %3397 = vmatprep.subr.mxu0 %v3659_v0 }
0x10ea   :  { %3398 = vmatpush3.msra.mxu0 %v4108_v18  ;;  %v2219_v39 = vpop.permute.xlu1 %2218 }
0x10eb   :  { %3399 = vmatprep.subr.mxu0 %v3659_v0  ;;  %v2048_v19 = vpop.permute.xlu0 %2047 }
0x10ec   :  { %3393 = vmatmul.mubr.msk.f32.vlgmr.msra.gmra.mxu1 %vm53_vm5, %v2048_v19  ;;  %3400 = vmatpush3.msra.mxu0 %v4113_v20 }
0x10ed   :  { %3407 = vmatpush3.msra.mxu1 %v4116_v26  ;;  %3401 = vmatprep.subr.mxu0 %v3659_v0 }
0x10ee   :  { %3408 = vmatprep.subr.mxu1 %v3659_v0  ;;  %3402 = vmatpush3.msra.mxu0 %v4121_v28 }
0x10ef   :  { %3409 = vmatpush3.msra.mxu1 %v4124_v21  ;;  %3404 = vmatmul.mubr.msk.f32.vlgmr.msra.gmra.mxu0 %vm53_vm5, %v2048_v19 }
0x10f0   :  { %3410 = vmatprep.mubr.msk.f32.mxu1 %vm3660_vm0, %v3659_v0  ;;  %3413 = vmatprep.subr.mxu1 %v3659_v0 }
0x10f1   :  { %3411 = vmatmul.mubr.msk.f32.vlgmr.msra.gmra.mxu1 %vm127_vm1, %v2219_v39  ;;  %3424 = vmatprep.subr.mxu0 %v3659_v0 }
0x10f2   :  { %3414 = vmatpush3.msra.mxu1 %v4133_v40  ;;  %3425 = vmatpush3.msra.mxu0 %v4136_v23 }
0x10f3   :  { %3415 = vmatprep.subr.mxu1 %v3659_v0  ;;  %3426 = vmatprep.subr.mxu0 %v3659_v0 }
0x10f4   :  { %3416 = vmatpush3.msra.mxu1 %v4141_v29  ;;  %3427 = vmatpush3.msra.mxu0 %v4144_v24 }
0x10f5   :  { %3417 = vmatprep.subr.mxu1 %v3659_v0  ;;  %3421 = vmatprep.mubr.msk.f32.mxu1 %vm3660_vm0, %v3659_v0 }
0x10f6   :  { %3418 = vmatpush3.msra.mxu1 %v4150_v25  ;;  %3428 = vmatprep.subr.mxu0 %v3659_v0 }
0x10f7   :  { %3419 = vmatprep.subr.mxu1 %v3659_v0  ;;  %3429 = vmatpush3.msra.mxu0 %v4155_v27 }
0x10f8   :  { %3420 = vmatpush3.msra.mxu1 %v4158_v38  ;;  %3430 = vmatprep.subr.mxu0 %v3659_v0 }
0x10f9   :  { %3435 = vmatprep.subr.mxu1 %v3659_v0  ;;  %3431 = vmatpush3.msra.mxu0 %v4163_v41 }
0x10fa   :  { %3432 = vmatprep.mubr.msk.f32.mxu0 %vm3660_vm0, %v3659_v0  ;;  %3446 = vmatprep.subr.mxu0 %v3659_v0 }
0x11a7   :  { %v2042_v1 = vpop.f32.mrf.mxu0 }
0x11a9   :  { %v3383_v2 = vpop.f32.mrf.mxu0 }
0x11ac   :  { %v2117_v3 = vpop.f32.mrf.mxu1 }
0x11ad   :  { %v2118_v4 = vadd.f32 %v2117_v3, %v2042_v1 }
0x11ae   :  { %v3394_v5 = vpop.f32.mrf.mxu1 }
0x11af   :  { %v2121_v6 = vadd.f32 %v3818_v45, %v2118_v4  ;;  %v2214_v7 = vpop.f32.mrf.mxu0 }
0x11b1   :  { %v2986_v30 = vmul.f32 -1.442695, %v2121_v6  ;;  %v2288_v31 = vpop.f32.mrf.mxu1  ;;  %v3405_v32 = vpop.f32.mrf.mxu0 }
0x11b2   :  { %v2289_v33 = vadd.f32 %v2288_v31, %v2214_v7 }
0x11b3   :  { %3565 = vpow2.f32 %v2986_v30  ;;  %v3412_v34 = vpop.f32.mrf.mxu1 }
0x11b4   :  { %v2292_v36 = vadd.f32 %v4170_v35, %v2289_v33 }
0x11b6   :  { %v2990_v37 = vmul.f32 -1.442695, %v2292_v36 }
0x11b8   :  { %3567 = vpow2.f32 %v2990_v37 }
0x11c0   :  { %v3566_v42 = vpop.eup %3565 }
0x11c1   :  { %v2125_v43 = vadd.f32 1.0, %v3566_v42 }
0x11c3   :  { %3569 = vrcp.f32 %v2125_v43 }
0x11c5   :  { %v3568_v44 = vpop.eup %3567 }
0x11c6   :  { %v2296_v46 = vadd.f32 1.0, %v3568_v44 }
0x11c8   :  { %3571 = vrcp.f32 %v2296_v46 }
0x11d0   :  { %v3570_v45 = vpop.eup %3569 }
0x11d1   :  { %v2128_v47 = vmul.f32 2.0, %v3570_v45 }
0x11d3   :  { %v2987_v48 = vadd.f32 -1.0, %v2128_v47 }
0x11d5   :  { %v3572_v49 = vpop.eup %3571  ;;  %v2130_v50 = vsel %vm3732_vm4, %v2987_v48, %v3570_v45 }
0x11d6   :  { %2133 = vrot.lane.b32.xlu0 %v2130_v50, %s3661_s17  ;;  %v2299_v51 = vmul.f32 2.0, %v3572_v49  ;;  %v2131_v57 = vmul.f32 %v2130_v50, %v4083_v60 }
0x11d8   :  { %v2991_v52 = vadd.f32 -1.0, %v2299_v51 }
0x11da   :  { %v2301_v53 = vsel %vm3732_vm4, %v2991_v52, %v3572_v49 }
0x11db   :  { %2304 = vrot.lane.b32.xlu1 %v2301_v53, %s3661_s17  ;;  %v2302_v61 = vmul.f32 %v2301_v53, %v4087_v63 }
0x1248   :  { %v2134_v10 = vpop.permute.xlu0 %2133 }
0x1249   :  { %v2136_v54 = vmul.f32 %v2134_v10, %v2130_v50 }
0x124b   :  { %2138 = vrot.lane.b32.xlu0 %v2136_v54, %s3662_s18 }
0x124d   :  { %v2305_v55 = vpop.permute.xlu1 %2304 }
0x124e   :  { %v2307_v56 = vmul.f32 %v2305_v55, %v2301_v53 }
0x1250   :  { %2309 = vrot.lane.b32.xlu1 %v2307_v56, %s3662_s18 }
0x12bd   :  { %v2139_v58 = vpop.permute.xlu0 %2138 }
0x12be   :  { %v4182_v59 = vadd.f32 %v2139_v58, %v2131_v57 }
0x12c0   :  { %3573 = vtanh.f32 %v4182_v59 }
0x12c2   :  { %v2310_v62 = vpop.permute.xlu1 %2309 }
0x12c3   :  { %v4186_v8 = vadd.f32 %v2310_v62, %v2302_v61 }
0x12c5   :  { %3575 = vtanh.f32 %v4186_v8 }
0x12cd   :  { %v3574_v9 = vpop.eup %3573 }
0x12ce   :  { %2144 = vrot.lane.b32.xlu0 %v3574_v9, %s3661_s17 }
0x12d2   :  { %v3576_v11 = vpop.eup %3575 }
0x12d3   :  { %2315 = vrot.lane.b32.xlu1 %v3576_v11, %s3661_s17 }
0x1340   :  { %v2145_v12 = vpop.permute.xlu0 %2144 }
0x1341   :  { %v2147_v60 = vmul.f32 %v2145_v12, %v2130_v50 }
0x1343   :  { %2320 = vrot.lane.b32.xlu0 %v2147_v60, %s3662_s18 }
0x1345   :  { %v2316_v13 = vpop.permute.xlu1 %2315 }
0x1346   :  { %v2318_v14 = vmul.f32 %v2316_v13, %v2301_v53 }
0x1347   :  { %2566 = vrot.lane.b32.xlu0 %v4096_v15, %s3667_s0 }
0x1348   :  { %2395 = vrot.lane.b32.xlu1 %v2318_v14, %s3662_s18 }
0x13b5   :  { %v2321_v63 = vpop.permute.xlu0 %2320 }
0x13b6   :  { %3422 = vmatmul.mubr.msk.f32.vlgmr.msra.gmra.mxu1 %vm53_vm5, %v2321_v63 }
0x13b7   :  { %3436 = vmatpush3.msra.mxu1 %v4102_v17  ;;  %3443 = vmatprep.mubr.msk.f32.mxu1 %vm3660_vm0, %v3659_v0 }
0x13b8   :  { %3437 = vmatprep.subr.mxu1 %v3659_v0 }
0x13b9   :  { %3438 = vmatpush3.msra.mxu1 %v4108_v18  ;;  %v2567_v15 = vpop.permute.xlu0 %2566 }
0x13ba   :  { %3439 = vmatprep.subr.mxu1 %v3659_v0  ;;  %v2396_v16 = vpop.permute.xlu1 %2395 }
0x13bb   :  { %3433 = vmatmul.mubr.msk.f32.vlgmr.msra.gmra.mxu0 %vm53_vm5, %v2396_v16  ;;  %3440 = vmatpush3.msra.mxu1 %v4113_v20 }
0x13bc   :  { %3447 = vmatpush3.msra.mxu0 %v4116_v26  ;;  %3441 = vmatprep.subr.mxu1 %v3659_v0 }
0x13bd   :  { %3448 = vmatprep.subr.mxu0 %v3659_v0  ;;  %3442 = vmatpush3.msra.mxu1 %v4121_v28  ;;  %v3611_v28 = vld [vmem:[#allocation2 + $0x78] ss:$0 sm:$0xff] }
0x13be   :  { %3449 = vmatpush3.msra.mxu0 %v4124_v21  ;;  %3444 = vmatmul.mubr.msk.f32.vlgmr.msra.gmra.mxu1 %vm53_vm5, %v2396_v16 }
0x13bf   :  { %3450 = vmatprep.mubr.msk.f32.mxu0 %vm3660_vm0, %v3659_v0  ;;  %3453 = vmatprep.subr.mxu0 %v3659_v0 }
0x13c0   :  { %3451 = vmatmul.mubr.msk.f32.vlgmr.msra.gmra.mxu0 %vm127_vm1, %v2567_v15  ;;  %3464 = vmatprep.subr.mxu1 %v3659_v0 }
0x13c1   :  { %3454 = vmatpush3.msra.mxu0 %v4133_v40  ;;  %3465 = vmatpush3.msra.mxu1 %v4136_v23 }
0x13c2   :  { %3455 = vmatprep.subr.mxu0 %v3659_v0  ;;  %3466 = vmatprep.subr.mxu1 %v3659_v0 }
0x13c3   :  { %3456 = vmatpush3.msra.mxu0 %v4141_v29  ;;  %3461 = vmatprep.mubr.msk.f32.mxu0 %vm3660_vm0, %v3659_v0 }
0x13c4   :  { %3457 = vmatprep.subr.mxu0 %v3659_v0  ;;  %3467 = vmatpush3.msra.mxu1 %v4144_v24 }
0x13c5   :  { %3458 = vmatpush3.msra.mxu0 %v4150_v25  ;;  %3468 = vmatprep.subr.mxu1 %v3659_v0 }
0x13c6   :  { %3459 = vmatprep.subr.mxu0 %v3659_v0  ;;  %3469 = vmatpush3.msra.mxu1 %v4155_v27 }
0x13c7   :  { %3460 = vmatpush3.msra.mxu0 %v4158_v38  ;;  %3470 = vmatprep.subr.mxu1 %v3659_v0 }
0x13c8   :  { %3471 = vmatpush3.msra.mxu1 %v4163_v41  ;;  %3472 = vmatprep.mubr.msk.f32.mxu1 %vm3660_vm0, %v3659_v0 }
0x13c9   :  { %3475 = vmatprep.subr.mxu0 %v3659_v0 }
0x1476   :  { %v2390_v17 = vpop.f32.mrf.mxu1 }
0x1478   :  { %v3423_v18 = vpop.f32.mrf.mxu1 }
0x1479   :  { %v45_v18 = vld [vmem:[#allocation2 + $0x98] sm:$0xff] }
0x147b   :  { %v2465_v19 = vpop.f32.mrf.mxu0 }
0x147c   :  { %v2466_v20 = vadd.f32 %v2465_v19, %v2390_v17  ;;  %v44_v19 = vld [vmem:[#allocation2 + $0x90] sm:$0xff] }
0x147d   :  { %v3434_v26 = vpop.f32.mrf.mxu0 }
0x147e   :  { %v2469_v39 = vadd.f32 %v3611_v28, %v2466_v20  ;;  %v2562_v21 = vpop.f32.mrf.mxu1  ;;  %v43_v20 = vld [vmem:[#allocation2 + $0x88] sm:$0xff] }
0x1480   :  { %v2994_v40 = vmul.f32 -1.442695, %v2469_v39  ;;  %v2636_v23 = vpop.f32.mrf.mxu0  ;;  %v3445_v29 = vpop.f32.mrf.mxu1 }
0x1481   :  { %v2637_v24 = vadd.f32 %v2636_v23, %v2562_v21 }
0x1482   :  { %3577 = vpow2.f32 %v2994_v40  ;;  %v3452_v25 = vpop.f32.mrf.mxu0  ;;  %v3004_v40 = vld [vmem:[#allocation2 + $0xa0] ss:$0 sm:$0xff] }
0x1483   :  { %v2640_v27 = vadd.f32 %v4170_v35, %v2637_v24 }
0x1485   :  { %v2998_v38 = vmul.f32 -1.442695, %v2640_v27 }
0x1487   :  { %3579 = vpow2.f32 %v2998_v38 }
0x148f   :  { %v3578_v41 = vpop.eup %3577 }
0x1490   :  { %v2473_v1 = vadd.f32 1.0, %v3578_v41 }
0x1492   :  { %3581 = vrcp.f32 %v2473_v1 }
0x1494   :  { %v3580_v2 = vpop.eup %3579 }
0x1495   :  { %v2644_v3 = vadd.f32 1.0, %v3580_v2 }
0x1497   :  { %3583 = vrcp.f32 %v2644_v3 }
0x149f   :  { %v3582_v4 = vpop.eup %3581 }
0x14a0   :  { %v2476_v5 = vmul.f32 2.0, %v3582_v4 }
0x14a2   :  { %v2995_v6 = vadd.f32 -1.0, %v2476_v5 }
0x14a4   :  { %v3584_v7 = vpop.eup %3583  ;;  %v2478_v30 = vsel %vm3732_vm4, %v2995_v6, %v3582_v4 }
0x14a5   :  { %2481 = vrot.lane.b32.xlu1 %v2478_v30, %s3661_s17  ;;  %v2647_v31 = vmul.f32 2.0, %v3584_v7  ;;  %v2479_v42 = vmul.f32 %v2478_v30, %v4182_v59 }
0x14a7   :  { %v2999_v32 = vadd.f32 -1.0, %v2647_v31 }
0x14a9   :  { %v2649_v33 = vsel %vm3732_vm4, %v2999_v32, %v3584_v7 }
0x14aa   :  { %2652 = vrot.lane.b32.xlu0 %v2649_v33, %s3661_s17  ;;  %v2650_v46 = vmul.f32 %v2649_v33, %v4186_v8 }
0x1517   :  { %v2482_v34 = vpop.permute.xlu1 %2481 }
0x1518   :  { %v2484_v35 = vmul.f32 %v2482_v34, %v2478_v30 }
0x151a   :  { %2486 = vrot.lane.b32.xlu1 %v2484_v35, %s3662_s18 }
0x151c   :  { %v2653_v36 = vpop.permute.xlu0 %2652 }
0x151d   :  { %v2655_v37 = vmul.f32 %v2653_v36, %v2649_v33 }
0x151f   :  { %2657 = vrot.lane.b32.xlu0 %v2655_v37, %s3662_s18 }
0x158c   :  { %v2487_v43 = vpop.permute.xlu1 %2486 }
0x158d   :  { %v2489_v44 = vadd.f32 %v2487_v43, %v2479_v42 }
0x158f   :  { %3585 = vtanh.f32 %v2489_v44 }
0x1591   :  { %v2658_v45 = vpop.permute.xlu0 %2657 }
0x1592   :  { %v2660_v47 = vadd.f32 %v2658_v45, %v2650_v46 }
0x1594   :  { %3587 = vtanh.f32 %v2660_v47 }
0x159c   :  { %v3586_v48 = vpop.eup %3585 }
0x159d   :  { %2492 = vrot.lane.b32.xlu1 %v3586_v48, %s3661_s17 }
0x15a1   :  { %v3588_v49 = vpop.eup %3587 }
0x15a2   :  { %2663 = vrot.lane.b32.xlu0 %v3588_v49, %s3661_s17 }
0x160f   :  { %v2493_v50 = vpop.permute.xlu1 %2492 }
0x1610   :  { %v2495_v51 = vmul.f32 %v2493_v50, %v2478_v30 }
0x1612   :  { %2668 = vrot.lane.b32.xlu1 %v2495_v51, %s3662_s18 }
0x1614   :  { %v2664_v52 = vpop.permute.xlu0 %2663 }
0x1615   :  { %v2666_v53 = vmul.f32 %v2664_v52, %v2649_v33 }
0x1617   :  { %2743 = vrot.lane.b32.xlu0 %v2666_v53, %s3662_s18 }
0x1684   :  { %v2669_v10 = vpop.permute.xlu1 %2668 }
0x1685   :  { %3462 = vmatmul.mubr.msk.f32.vlgmr.msra.gmra.mxu0 %vm53_vm5, %v2669_v10 }
0x1686   :  { %3483 = vmatprep.mubr.msk.f32.mxu0 %vm3660_vm0, %v3659_v0  ;;  %3476 = vmatpush3.msra.mxu0 %v45_v18 }
0x1687   :  { %3477 = vmatprep.subr.mxu0 %v3659_v0 }
0x1688   :  { %3478 = vmatpush3.msra.mxu0 %v44_v19 }
0x1689   :  { %v2744_v54 = vpop.permute.xlu0 %2743  ;;  %3479 = vmatprep.subr.mxu0 %v3659_v0 }
0x168a   :  { %3473 = vmatmul.mubr.msk.f32.vlgmr.msra.gmra.mxu1 %vm53_vm5, %v2744_v54  ;;  %3480 = vmatpush3.msra.mxu0 %v43_v20 }
0x168b   :  { %3481 = vmatprep.subr.mxu0 %v3659_v0 }
0x168c   :  { %3482 = vmatpush3.msra.mxu0 %v42_v22 }
0x1745   :  { %v2738_v55 = vpop.f32.mrf.mxu0 }
0x1747   :  { %v3463_v56 = vpop.f32.mrf.mxu0 }
0x174a   :  { %v2813_v57 = vpop.f32.mrf.mxu1 }
0x174b   :  { %v2814_v58 = vadd.f32 %v2813_v57, %v2738_v55 }
0x174c   :  { %v3474_v59 = vpop.f32.mrf.mxu1 }
0x174d   :  { %v2817_v61 = vadd.f32 %v3611_v28, %v2814_v58 }
0x174f   :  { %v3002_v62 = vmul.f32 -1.442695, %v2817_v61 }
0x1751   :  { %3589 = vpow2.f32 %v3002_v62 }
0x175e   :  { %v3590_v8 = vpop.eup %3589 }
0x175f   :  { %v2821_v9 = vadd.f32 1.0, %v3590_v8 }
0x1761   :  { %3591 = vrcp.f32 %v2821_v9 }
0x176e   :  { %v3592_v11 = vpop.eup %3591 }
0x176f   :  { %v2824_v12 = vmul.f32 2.0, %v3592_v11 }
0x1771   :  { %v3003_v60 = vadd.f32 -1.0, %v2824_v12 }
0x1773   :  { %v2826_v13 = vsel %vm3732_vm4, %v3003_v60, %v3592_v11 }
0x1774   :  { %2829 = vrot.lane.b32.xlu1 %v2826_v13, %s3661_s17  ;;  %v2827_v16 = vmul.f32 %v2826_v13, %v2489_v44 }
0x17e6   :  { %v2830_v14 = vpop.permute.xlu1 %2829 }
0x17e7   :  { %v2832_v63 = vmul.f32 %v2830_v14, %v2826_v13 }
0x17e9   :  { %2834 = vrot.lane.b32.xlu0 %v2832_v63, %s3662_s18 }
0x185b   :  { %v2835_v15 = vpop.permute.xlu0 %2834 }
0x185c   :  { %v2837_v17 = vadd.f32 %v2835_v15, %v2827_v16 }
0x185e   :  { %3593 = vtanh.f32 %v2837_v17 }
0x186b   :  { %v3594_v26 = vpop.eup %3593 }
0x186c   :  { %2840 = vrot.lane.b32.xlu1 %v3594_v26, %s3661_s17 }
0x18de   :  { %v2841_v28 = vpop.permute.xlu1 %2840 }
0x18df   :  { %v2843_v39 = vmul.f32 %v2841_v28, %v2826_v13 }
0x18e1   :  { %2849 = vrot.lane.b32.xlu0 %v2843_v39, %s3662_s18 }
0x1953   :  { %v2850_v21 = vpop.permute.xlu0 %2849 }
0x1954   :  { %3484 = vmatmul.mubr.msk.f32.vlgmr.msra.gmra.mxu0 %vm53_vm5, %v2850_v21 }
0x1a14   :  { %v2919_v23 = vpop.f32.mrf.mxu0 }
0x1a15   :  { %v2920_v29 = vadd.f32 %v3004_v40, %v2919_v23 }
0x1a16   :  { %v3485_v24 = vpop.f32.mrf.mxu0 }
0x1a17   :  { %2924 = vst.msk [vmem:[#allocation5] sm:$0x3] %vm2923_vm6, %v2920_v29 }
0x1a18   :  { %3643 = shalt.err (!%p3640_p9)
}
0x1a19   :  { %2934 = dma.vmem_to_hbm [thread:$0]  %s2932_s26, 32, %s4267_s2, [#allocation4]  }
0x1a1a   :  { %3654 = dma.done.wait [#allocation4], 32  }
0x1a1b   :  { %3655 = vsyncadd [#allocation4], 4294967264 }
0x1a1c   :  { %2938 = vsyncpa [#allocation3], 1 }
0x1a1d   :  { %2939 = vsyncpa [#allocation4], 1 }

</bundles_post_ra>
